<compile_context>
chip_gen: v5e
topology: v5e:2x2
jax: 0.10.0
libtpu: 0.0.40
codegen_flags: <defaults>
</compile_context>

<pallas_src>
import functools

import jax
import jax.numpy as jnp
import numpy as np
from jax.experimental import pallas as pl
from jax.experimental.pallas import tpu as pltpu


def _vmem_budget_bytes():
    """Generation-aware scoped-VMEM budget (leave ~1/3 headroom for compiler scratch)."""
    try:
        cap = int(pltpu.get_tpu_info().vmem_capacity_bytes)
    except Exception:
        cap = 64 * 1024 * 1024          # conservative fallback (v7x-sized)
    # v7x (64 MiB physical) -> ~43 MiB scoped ; v5e/v6e (128 MiB) -> ~87 MiB scoped.
    return int(cap * 0.68)


def _projector_kernel(ctx_ref, dyn_ref, ones_ref, bias_ref, gamma_ref, beta_ref,
                      out_ref, *, inv_c, eps, matmul_dtype, precision):
    """One (batch, row-tile) step: bmm + bias + ReLU + LayerNorm, lane-dense.

    ctx_ref  : [1, tp, P*N*C]  context tile, native dtype (cast here, per review)
    dyn_ref  : [1, P*N*C, P*C] per-batch block-diagonal dynamic kernel (f32)
    ones_ref : [P*C, P*C]      block-diagonal ones -> LN reductions on the MXU
    bias/gamma/beta : [1, P*C] parameters tiled to 128 lanes
    out_ref  : [1, tp, P*C]    lane-dense output tile
    """
    f32 = jnp.float32
    md = matmul_dtype

    ctx = ctx_ref[0].astype(md)                                        # [tp, P*N*C]
    dyn = dyn_ref[0].astype(md)                                        # [P*N*C, P*C]
    proj = jnp.dot(ctx, dyn, preferred_element_type=f32,
                   precision=precision)                                # [tp, P*C]
    proj = jnp.maximum(proj + bias_ref[...], 0.0)                      # bias + ReLU
    # TODO(synk): nn.Dropout(0.1) is identity in eval mode; training-mode dropout
    # would need pltpu.prng_seed / pltpu.prng_random_bits here.

    # Per-original-row LayerNorm stats via block-diagonal ones matmuls (MXU, not XLU).
    ones_bd = ones_ref[...].astype(md)                                 # [P*C, P*C]
    mean = jnp.dot(proj.astype(md), ones_bd, preferred_element_type=f32,
                   precision=precision) * inv_c                        # [tp, P*C]
    cen = proj - mean
    var = jnp.dot((cen * cen).astype(md), ones_bd, preferred_element_type=f32,
                  precision=precision) * inv_c                         # [tp, P*C]

    # Fused epilogue: out = cen * (gamma / sqrt(var+eps)) + beta  (one FMA pass).
    scale = gamma_ref[...] / jnp.sqrt(var + eps)
    out_ref[0] = (cen * scale + beta_ref[...]).astype(out_ref.dtype)


def low_rank_dynamic_projector(phrase_emb, context_emb, params, *, r, eps=1e-5,
                               matmul_dtype=jnp.bfloat16, out_dtype=jnp.float32,
                               block_rows=None):
    """
    phrase_emb:  [B, N, C]      context_emb: [B, T, N, C]
    returns [B, T, C] in `out_dtype` (f32 default; bf16 halves writeback traffic).
    matmul_dtype=f32 reproduces exact f32 semantics; bf16 streams the MXU (f32 acc).
    """
    B, N, C = phrase_emb.shape
    T = context_emb.shape[1]
    assert context_emb.shape == (B, T, N, C)
    NC = N * C
    f32 = jnp.float32
    exact = jnp.dtype(matmul_dtype) == jnp.dtype(jnp.float32)
    precision = jax.lax.Precision.HIGHEST if exact else None

    # ------------------------------------------------------------------
    # Per-batch dynamic kernel (tiny, ~N*C*C floats/batch) precomputed in the
    # wrapper (review item: removes the in-kernel relayout + cross-T scratch
    # carry so both grid axes can be "parallel").
    # ------------------------------------------------------------------
    wp = params["proj_phrase_w"].astype(f32)                       # [C*r, C]
    bp = params["proj_phrase_b"].astype(f32)                       # [C*r]
    shared = params["shared_param"].astype(f32)                    # [r, C]
    k1 = jnp.matmul(phrase_emb.astype(f32), wp.T, precision="highest") + bp
    dyn = jnp.matmul(k1.reshape(B, N, C, r), shared,
                     precision="highest").reshape(B, NC, C)        # [B, N*C, C]

    # Lane-dense packing factor: P original rows per 128-lane output row.
    P = 128 // C if (C < 128 and 128 % C == 0 and T % (128 // C) == 0) else 1
    PNC, PC = P * NC, P * C
    rows = T // P

    if P > 1:
        # Block-diagonal expansion -> main matmul directly emits [tp, 128] tiles.
        dyn_bd = jnp.einsum("pq,bmc->bpmqc", jnp.eye(P, dtype=f32),
                            dyn).reshape(B, PNC, PC)
    else:
        dyn_bd = dyn
    seg = jnp.arange(PC) // C
    ones_bd = (seg[:, None] == seg[None, :]).astype(f32)           # [PC, PC]

    bias_t = jnp.tile(params["bias"].astype(f32).reshape(1, C), (1, P))
    gamma_t = jnp.tile(params["ln_gamma"].astype(f32).reshape(1, C), (1, P))
    beta_t = jnp.tile(params["ln_beta"].astype(f32).reshape(1, C), (1, P))

    # Packed context view: free reshape of the contiguous [B, T, N, C] stream.
    # No astype / pad / slice of the dominant stream in the wrapper.
    ctx = context_emb.reshape(B, rows, PNC)

    # ------------------------------------------------------------------
    # Row-tile size: grow toward the generation-aware VMEM budget.
    # ------------------------------------------------------------------
    budget = _vmem_budget_bytes()
    in_b = jnp.dtype(context_emb.dtype).itemsize
    md_b = jnp.dtype(matmul_dtype).itemsize
    out_b = jnp.dtype(out_dtype).itemsize
    fixed = (2 * PNC * PC * 4 + PNC * PC * md_b        # dyn_bd buffers + in-kernel cast
             + PC * PC * (4 + md_b)                    # ones_bd
             + 8 * PC * 4 + 2 * 1024 * 1024)           # vectors + headroom
    per_row = (2 * PNC * in_b                          # ctx tile, double-buffered
               + PNC * md_b                            # in-kernel cast copy
               + 2 * PC * out_b                        # out tile, double-buffered
               + 7 * PC * 4 + 2 * PC * md_b)           # f32 / md intermediates
    auto = max(8, (budget - fixed) // per_row)
    target = int(block_rows) if block_rows is not None else int(auto)
    target = min(target, 8192)                         # sanity cap
    if rows <= 8:
        tp = rows                                      # block == full extent
    else:
        tp = min(max(8, (target // 8) * 8), (rows // 8) * 8)
    n_tiles = pl.cdiv(rows, tp)                        # ragged tail: Pallas boundary blocks

    kernel = functools.partial(_projector_kernel, inv_c=1.0 / C, eps=eps,
                               matmul_dtype=matmul_dtype, precision=precision)

    cost = pl.CostEstimate(
        flops=int(2 * B * T * NC * C + 4 * B * T * C * PC + 8 * B * T * C),
        transcendentals=int(B * T),
        bytes_accessed=int(ctx.size * in_b + B * T * C * out_b
                           + B * PNC * PC * 4 + PC * PC * 4),
    )

    out = pl.pallas_call(
        kernel,
        out_shape=jax.ShapeDtypeStruct((B, rows, PC), out_dtype),
        grid=(B, n_tiles),
        in_specs=[
            # Dominant HBM stream: large lane-dense tiles, native dtype.
            # (Add pipeline_mode=pl.Buffered(3) here only if a v5e/v6e profile
            #  still shows exposed DMA; not worth the VMEM on 64 MiB v7x.)
            pl.BlockSpec((1, tp, PNC), lambda b, t: (b, t, 0)),
            pl.BlockSpec((1, PNC, PC), lambda b, t: (b, 0, 0)),    # dyn_bd (per batch)
            pl.BlockSpec((PC, PC), lambda b, t: (0, 0)),           # block-diag ones
            pl.BlockSpec((1, PC), lambda b, t: (0, 0)),            # bias (tiled)
            pl.BlockSpec((1, PC), lambda b, t: (0, 0)),            # LN gamma (tiled)
            pl.BlockSpec((1, PC), lambda b, t: (0, 0)),            # LN beta (tiled)
        ],
        out_specs=pl.BlockSpec((1, tp, PC), lambda b, t: (b, t, 0)),
        compiler_params=pltpu.CompilerParams(
            # No cross-iteration carry -> both axes independent (megacore / 2-TC).
            dimension_semantics=("parallel", "parallel"),
            vmem_limit_bytes=int(budget),
        ),
        cost_estimate=cost,
    )(ctx, dyn_bd, ones_bd, bias_t, gamma_t, beta_t)

    return out.reshape(B, T, C)                        # free reshape, no slice


def _reference(phrase_emb, context_emb, params, *, r, eps=1e-5):
    """Pure-JAX (f32) mirror of the PyTorch forward (eval mode)."""
    B, N, C = phrase_emb.shape
    T = context_emb.shape[1]
    ctx = context_emb.reshape(B, T, N * C)
    k1 = phrase_emb @ params["proj_phrase_w"].T + params["proj_phrase_b"]
    dyn = (k1.reshape(B, N, C, r) @ params["shared_param"]).reshape(B, N * C, C)
    proj = jnp.einsum("btm,bmc->btc", ctx, dyn) + params["bias"]
    proj = jnp.maximum(proj, 0.0)
    mean = proj.mean(-1, keepdims=True)
    var = ((proj - mean) ** 2).mean(-1, keepdims=True)
    return (proj - mean) / jnp.sqrt(var + eps) * params["ln_gamma"] + params["ln_beta"]


if __name__ == "__main__":
    # Full-f32 matmuls everywhere so the strict check compares like against like.
    jax.config.update("jax_default_matmul_precision", "highest")

    B, N, C, r = 2, 4, 32, 4          # hdim = C = 32, low rank r = 4
    key = jax.random.PRNGKey(0)
    kp, kc, kw, kb, ks, kc2, kc3 = jax.random.split(key, 7)

    phrase_emb = jax.random.normal(kp, (B, N, C), dtype=jnp.float32)
    bound = 1.0 / np.sqrt(C)
    params = {
        "proj_phrase_w": jax.random.uniform(kw, (C * r, C), jnp.float32, -bound, bound),
        "proj_phrase_b": jax.random.uniform(kb, (C * r,), jnp.float32, -bound, bound),
        "shared_param": jax.random.normal(ks, (r, C), dtype=jnp.float32),
        "bias": jnp.zeros((C,), jnp.float32),
        "ln_gamma": jnp.ones((C,), jnp.float32),
        "ln_beta": jnp.zeros((C,), jnp.float32),
    }

    # 1) T=8: lane-packed path (P=4), single tile, exact f32 semantics.
    T = 8
    context_emb = jax.random.normal(kc, (B, T, N, C), dtype=jnp.float32)
    ref = _reference(phrase_emb, context_emb, params, r=r)
    out = jax.block_until_ready(
        low_rank_dynamic_projector(phrase_emb, context_emb, params, r=r,
                                   matmul_dtype=jnp.float32))
    np.testing.assert_allclose(np.asarray(out), np.asarray(ref), rtol=5e-5, atol=5e-5)

    # 2) Same input on the fast path: bf16 MXU stream + bf16 writeback.
    out_bf = jax.block_until_ready(
        low_rank_dynamic_projector(phrase_emb, context_emb, params, r=r,
                                   matmul_dtype=jnp.bfloat16, out_dtype=jnp.bfloat16))
    np.testing.assert_allclose(np.asarray(out_bf.astype(jnp.float32)),
                               np.asarray(ref), rtol=6e-2, atol=6e-2)

    # 3) T=40: lane-packed path, multiple row tiles + ragged last tile
    #    (rows=10, forced tile=8) -> exercises Pallas boundary-block handling.
    T2 = 40
    context_emb2 = jax.random.normal(kc2, (B, T2, N, C), dtype=jnp.float32)
    ref2 = _reference(phrase_emb, context_emb2, params, r=r)
    out2 = jax.block_until_ready(
        low_rank_dynamic_projector(phrase_emb, context_emb2, params, r=r,
                                   matmul_dtype=jnp.float32, block_rows=8))
    np.testing.assert_allclose(np.asarray(out2), np.asarray(ref2), rtol=5e-5, atol=5e-5)

    # 4) T=42 (not a multiple of 128//C): unpacked fallback path, ragged tiles.
    T3 = 42
    context_emb3 = jax.random.normal(kc3, (B, T3, N, C), dtype=jnp.float32)
    ref3 = _reference(phrase_emb, context_emb3, params, r=r)
    out3 = jax.block_until_ready(
        low_rank_dynamic_projector(phrase_emb, context_emb3, params, r=r,
                                   matmul_dtype=jnp.float32, block_rows=16))
    np.testing.assert_allclose(np.asarray(out3), np.asarray(ref3), rtol=5e-5, atol=5e-5)

    print("KERNEL_OK")
</pallas_src>

<mosaic_0001>
module attributes {stable_mosaic.version = 11 : i64} {
  func.func @_projector_kernel(%arg0: i32, %arg1: i32, %arg2: memref<1x2x512xf32, #tpu.memory_space<vmem>>, %arg3: memref<1x512x128xf32, #tpu.memory_space<vmem>>, %arg4: memref<128x128xf32, #tpu.memory_space<vmem>>, %arg5: memref<1x128xf32, #tpu.memory_space<vmem>>, %arg6: memref<1x128xf32, #tpu.memory_space<vmem>>, %arg7: memref<1x128xf32, #tpu.memory_space<vmem>>, %arg8: memref<1x2x128xf32, #tpu.memory_space<vmem>>) attributes {dimension_semantics = [#tpu.dimension_semantics<parallel>, #tpu.dimension_semantics<parallel>], iteration_bounds = array<i64: 2, 1>, scalar_prefetch = 0 : i64, scratch_operands = 0 : i64, tpu.core_type = #tpu.core_type<tc>, window_params = [{transform_indices = @transform_0, window_bounds = array<i64: 1, 2, 512>}, {transform_indices = @transform_1, window_bounds = array<i64: 1, 512, 128>}, {pipeline_mode = #tpu.pipeline_mode<synchronous>, transform_indices = @transform_2, window_bounds = array<i64: 128, 128>}, {pipeline_mode = #tpu.pipeline_mode<synchronous>, transform_indices = @transform_3, window_bounds = array<i64: 1, 128>}, {pipeline_mode = #tpu.pipeline_mode<synchronous>, transform_indices = @transform_4, window_bounds = array<i64: 1, 128>}, {pipeline_mode = #tpu.pipeline_mode<synchronous>, transform_indices = @transform_5, window_bounds = array<i64: 1, 128>}, {transform_indices = @transform_6, window_bounds = array<i64: 1, 2, 128>}]} {
    %c0 = arith.constant 0 : index
    %c0_0 = arith.constant 0 : index
    %c0_1 = arith.constant 0 : index
    %0 = vector.load %arg2[%c0, %c0_0, %c0_1] : memref<1x2x512xf32, #tpu.memory_space<vmem>>, vector<1x2x512xf32>
    %1 = vector.shape_cast %0 : vector<1x2x512xf32> to vector<2x512xf32>
    %c0_2 = arith.constant 0 : index
    %c0_3 = arith.constant 0 : index
    %c0_4 = arith.constant 0 : index
    %2 = vector.load %arg3[%c0_2, %c0_3, %c0_4] : memref<1x512x128xf32, #tpu.memory_space<vmem>>, vector<1x512x128xf32>
    %3 = vector.shape_cast %2 : vector<1x512x128xf32> to vector<512x128xf32>
    %cst = arith.constant dense<0.000000e+00> : vector<2x128xf32>
    %4 = tpu.matmul %1, %3, %cst {dimension_numbers = #tpu.dot_dimension_numbers<[1], [0], [0], [1], [0, 0, 1, 1], [], []>, precision = #tpu.contract_precision<fp32>} : vector<2x512xf32>, vector<512x128xf32>, vector<2x128xf32> -> vector<2x128xf32>
    %c0_5 = arith.constant 0 : index
    %c0_6 = arith.constant 0 : index
    %5 = vector.load %arg5[%c0_5, %c0_6] : memref<1x128xf32, #tpu.memory_space<vmem>>, vector<1x128xf32>
    %6 = vector.broadcast %5 : vector<1x128xf32> to vector<2x128xf32>
    %7 = arith.addf %4, %6 : vector<2x128xf32>
    %cst_7 = arith.constant 0.000000e+00 : f32
    %8 = vector.broadcast %cst_7 : f32 to vector<2x128xf32>
    %9 = arith.maximumf %7, %8 : vector<2x128xf32>
    %c0_8 = arith.constant 0 : index
    %c0_9 = arith.constant 0 : index
    %10 = vector.load %arg4[%c0_8, %c0_9] : memref<128x128xf32, #tpu.memory_space<vmem>>, vector<128x128xf32>
    %cst_10 = arith.constant dense<0.000000e+00> : vector<2x128xf32>
    %11 = tpu.matmul %9, %10, %cst_10 {dimension_numbers = #tpu.dot_dimension_numbers<[1], [0], [0], [1], [0, 0, 1, 1], [], []>, precision = #tpu.contract_precision<fp32>} : vector<2x128xf32>, vector<128x128xf32>, vector<2x128xf32> -> vector<2x128xf32>
    %cst_11 = arith.constant 3.125000e-02 : f32
    %12 = vector.broadcast %cst_11 : f32 to vector<2x128xf32>
    %13 = arith.mulf %11, %12 : vector<2x128xf32>
    %14 = arith.subf %9, %13 : vector<2x128xf32>
    %15 = arith.mulf %14, %14 : vector<2x128xf32>
    %cst_12 = arith.constant dense<0.000000e+00> : vector<2x128xf32>
    %16 = tpu.matmul %15, %10, %cst_12 {dimension_numbers = #tpu.dot_dimension_numbers<[1], [0], [0], [1], [0, 0, 1, 1], [], []>, precision = #tpu.contract_precision<fp32>} : vector<2x128xf32>, vector<128x128xf32>, vector<2x128xf32> -> vector<2x128xf32>
    %cst_13 = arith.constant 3.125000e-02 : f32
    %17 = vector.broadcast %cst_13 : f32 to vector<2x128xf32>
    %18 = arith.mulf %16, %17 : vector<2x128xf32>
    %c0_14 = arith.constant 0 : index
    %c0_15 = arith.constant 0 : index
    %19 = vector.load %arg6[%c0_14, %c0_15] : memref<1x128xf32, #tpu.memory_space<vmem>>, vector<1x128xf32>
    %cst_16 = arith.constant 9.99999974E-6 : f32
    %20 = vector.broadcast %cst_16 : f32 to vector<2x128xf32>
    %21 = arith.addf %18, %20 : vector<2x128xf32>
    %22 = math.sqrt %21 : vector<2x128xf32>
    %23 = vector.broadcast %19 : vector<1x128xf32> to vector<2x128xf32>
    %24 = arith.divf %23, %22 : vector<2x128xf32>
    %25 = arith.mulf %14, %24 : vector<2x128xf32>
    %c0_17 = arith.constant 0 : index
    %c0_18 = arith.constant 0 : index
    %26 = vector.load %arg7[%c0_17, %c0_18] : memref<1x128xf32, #tpu.memory_space<vmem>>, vector<1x128xf32>
    %27 = vector.broadcast %26 : vector<1x128xf32> to vector<2x128xf32>
    %28 = arith.addf %25, %27 : vector<2x128xf32>
    %c0_19 = arith.constant 0 : index
    %c0_20 = arith.constant 0 : index
    %c0_21 = arith.constant 0 : index
    %29 = vector.load %arg8[%c0_19, %c0_20, %c0_21] : memref<1x2x128xf32, #tpu.memory_space<vmem>>, vector<1x2x128xf32>
    %30 = vector.shape_cast %29 : vector<1x2x128xf32> to vector<2x128xf32>
    %31 = vector.shape_cast %28 : vector<2x128xf32> to vector<1x2x128xf32>
    tpu.vector_store %arg8[%c0_19, %c0_20, %c0_21], %31 {strides = array<i32>} : memref<1x2x128xf32, #tpu.memory_space<vmem>>, vector<1x2x128xf32>,
    return
  }
  func.func @transform_0(%arg0: i32, %arg1: i32) -> (i32, i32, i32) {
    %c0_i32 = arith.constant 0 : i32
    %c0_i32_0 = arith.constant 0 : i32
    return %arg0, %arg1, %c0_i32 : i32, i32, i32
  }
  func.func @transform_1(%arg0: i32, %arg1: i32) -> (i32, i32, i32) {
    %c0_i32 = arith.constant 0 : i32
    %c0_i32_0 = arith.constant 0 : i32
    %c0_i32_1 = arith.constant 0 : i32
    return %arg0, %c0_i32, %c0_i32_0 : i32, i32, i32
  }
  func.func @transform_2(%arg0: i32, %arg1: i32) -> (i32, i32) {
    %c0_i32 = arith.constant 0 : i32
    %c0_i32_0 = arith.constant 0 : i32
    %c0_i32_1 = arith.constant 0 : i32
    return %c0_i32, %c0_i32_0 : i32, i32
  }
  func.func @transform_3(%arg0: i32, %arg1: i32) -> (i32, i32) {
    %c0_i32 = arith.constant 0 : i32
    %c0_i32_0 = arith.constant 0 : i32
    %c0_i32_1 = arith.constant 0 : i32
    return %c0_i32, %c0_i32_0 : i32, i32
  }
  func.func @transform_4(%arg0: i32, %arg1: i32) -> (i32, i32) {
    %c0_i32 = arith.constant 0 : i32
    %c0_i32_0 = arith.constant 0 : i32
    %c0_i32_1 = arith.constant 0 : i32
    return %c0_i32, %c0_i32_0 : i32, i32
  }
  func.func @transform_5(%arg0: i32, %arg1: i32) -> (i32, i32) {
    %c0_i32 = arith.constant 0 : i32
    %c0_i32_0 = arith.constant 0 : i32
    %c0_i32_1 = arith.constant 0 : i32
    return %c0_i32, %c0_i32_0 : i32, i32
  }
  func.func @transform_6(%arg0: i32, %arg1: i32) -> (i32, i32, i32) {
    %c0_i32 = arith.constant 0 : i32
    %c0_i32_0 = arith.constant 0 : i32
    return %arg0, %arg1, %c0_i32 : i32, i32, i32
  }
}

</mosaic_0001>

<bundles_post_ra>
// kernel: tpu_custom_call.1
= control target key start
LH: loop header
LB: loop body
LE: loop exit
PB: predicated region body
PF: predicated region fallthrough
CT: control target
= control target key end

     0   :  { %s4640_s0 = inlined_call_operand.hbm [shape: f32[2,2,512], index: 0, kind: input, shape index: {}]   ;;  %s4641_s1 = inlined_call_operand.hbm [shape: f32[2,512,128], index: 1, kind: input, shape index: {}]   ;;  %s4642_s2 = inlined_call_operand.hbm [shape: f32[128,128], index: 2, kind: input, shape index: {}]   ;;  %s4643_s3 = inlined_call_operand.vmem [shape: f32[1,128], index: 3, kind: input, shape index: {}]   ;;  %s4644_s4 = inlined_call_operand.vmem [shape: f32[1,128], index: 4, kind: input, shape index: {}]   ;;  %s4645_s5 = inlined_call_operand.vmem [shape: f32[1,128], index: 5, kind: input, shape index: {}]   ;;  %s4646_s6 = inlined_call_operand.hbm [shape: f32[2,2,128], index: 6, kind: output, shape index: {}]  }
   0x1   :  { %4699 = sst [smem:[#allocation24_spill]] %s4642_s2 }
   0x2   :  { %4700 = sst [smem:[#allocation25_spill]] %s4645_s5 }
   0x3   :  { %11 = vsyncpa [#allocation3], 0 }
   0x4   :  { %13 = vsyncpa [#allocation3 + $0x1], 0 }
   0x5   :  { %14 = vsyncpa [#allocation6], 0 }
   0x6   :  { %16 = vsyncpa [#allocation6 + $0x1], 0 }
   0x7   :  { %17 = vsyncpa [#allocation4], 0 }
   0x8   :  { %19 = vsyncpa [#allocation4 + $0x1], 0  ;;  %s2991_s21 = smov 0   ;;  %s2993_s22 = smov 0  }
   0x9   :  { %s2995_s23 = smov 0   ;;  %s2997_s24 = smov 0  }
   0xa   :  { %s2999_s25 = smov 0   ;;  %s3001_s26 = smov 0  }
   0xb LB: > { %4701 = sst [smem:[#allocation13_spill]] %s2931_s21  ;;  %s3022_s27 = sadd.s32 4294967295, %s2951_s26   ;;  %s2951_s26 = sphi %s3001_s26, %s25_s26   ;;  %s2947_s25 = sphi %s2999_s25, %s4798_s25   ;;  %s2943_s24 = sphi %s2997_s24, %s4797_s24   ;;  %s2939_s23 = sphi %s2995_s23, %s4793_s23   ;;  %s2935_s22 = sphi %s2993_s22, %s4796_s22   ;;  %s2931_s21 = sphi %s2991_s21, %s4795_s21  }
   0xc   : > { %4702 = sst [smem:[#allocation14_spill]] %s2939_s23  ;;  %p2664_p0 = scmp.ge.s32.totalorder %s2951_s26, 1 }
   0xd   : > { %p60_p1 = scmp.eq.s32.totalorder %s3022_s27, 0  ;;  %p208_p2 = scmp.lt.s32.totalorder %s2951_s26, 3 }
   0xe   : > { %s4703_s2 = sld [smem:[#allocation24_spill]]  ;;  %s2953_s8 = smov [#allocation7]  }
   0xf   : > { %p3030_p3 = pnand %p2664_p0, %p208_p2  ;;  %s221_s9 = sshll.u32 %s2953_s8, 4  ;;  %s222_s9 = int_to_ptr.vmem [resolvable:$true] %s221_s9 }
  0x10   : > { %p2666_p6 = scmp.ge.s32.totalorder %s2951_s26, 2  ;;  %s4647_s10 = smov 128  }
  0x11   : > { %p2694_p4 = pneg %p3030_p3  ;;  %s4648_s11 = smov 8  }
  0x12   : > { %s2663_s12 = sadd.s32 4294967294, %s2951_s26   ;;  %s37_s13 = sadd.s32 1, %s2947_s25 }
  0x13   : > { %p2695_p5 = pnand %p2694_p4, %p60_p1  ;;  %s46_s14 = sadd.s32 1, %s2939_s23 }
  0x14   : > { %s219_s30 = sshll.u32 %s4703_s2, 4  ;;  %p39_p7 = scmp.ge.s32.totalorder %s37_s13, 2  ;;  %s220_s30 = int_to_ptr.hbm [resolvable:$true] %s219_s30 }
  0x15   : > { %2697 = dma.hbm_to_vmem [thread:$0]  (!%p2695_p5), %s220_s30, 2048, %s222_s9, [#allocation6], %s4647_s10, %s4647_s10, %s4648_s11  }
  0x16   : > { %p53_p8 = scmp.ne.s32.totalorder %s2939_s23, %s2935_s22  ;;  %p54_p9 = scmp.eq.s32.totalorder %s2951_s26, 0 }
  0x17   : > { %p59_p10 = scmp.ne.s32.totalorder %s2935_s22, %s2931_s21  ;;  %s4800_s13 = smov (%p39_p7, %s37_s13), 0 }
  0x18   : > { %4705 = sst [smem:[#allocation15_spill]] %s4800_s13  ;;  %p3052_p11 = por %p54_p9, %p53_p8 }
  0x19   : > { %p3058_p12 = por %p60_p1, %p59_p10  ;;  %s41_s17 = ssub.s32 %s2947_s25, %s4800_s13 }
  0x1a   : > { %p195_p13 = scmp.eq.s32.totalorder %s3022_s27, 1  ;;  %p44_p0 = scmp.eq.s32.totalorder %s41_s17, 0 }
  0x1b   : > { %p201_p2 = scmp.eq.s32.totalorder %s2663_s12, 1  ;;  %p2710_p5 = scmp.lt.s32.totalorder %s2951_s26, 2 }
  0x1c   : > { %p3065_p4 = por %p195_p13, %p53_p8  ;;  %s244_s28 = sand.u32 1, %s2939_s23  }
  0x1d   : > { %s3071_s19 = scalar_select %p44_p0, %s2939_s23, %s46_s14  }
  0x1e   : > { %p3073_p7 = por %p201_p2, %p59_p10  ;;  %s2667_s29 = sshll.u32 %s244_s28, 3 }
  0x1f   : > { %4709 = sst [smem:[#allocation16_spill]] %s3071_s19  ;;  %s2682_s30 = sshll.u32 %s2947_s25, 3 }
  0x20   : > { %s4710_s20 = scalar_select %p3073_p7, 1, 0 }
  0x21   : > { %s255_s12 = scalar_lea.hbm %s4640_s0, %s2682_s30  ;;  %s248_s17 = scalar_lea.vmem [#allocation2], %s2667_s29 }
  0x22   : > { %4711 = sst [smem:[#allocation17_spill]] %s4710_s20  ;;  %s259_s10 = sshll.u32 %s248_s17, 4  ;;  %s260_s10 = int_to_ptr.vmem [resolvable:$true] %s259_s10 }
  0x23   : > { %s257_s11 = sshll.u32 %s255_s12, 4  ;;  %p2699_p8 = pnand %p2710_p5, %p3052_p11  ;;  %s258_s11 = int_to_ptr.hbm [resolvable:$true] %s257_s11 }
  0x24   : > { %s2670_s14 = sshll.u32 %s244_s28, 9  ;;  %s2683_s2 = sshll.u32 %s2947_s25, 9 }
  0x25   : > { %s245_s13 = scalar_lea.sflag [#allocation3], %s244_s28  ;;  %s270_s19 = scalar_lea.vmem [#allocation5], %s2670_s14 }
  0x26   : > { %2701 = dma.hbm_to_vmem [thread:$0]  (!%p2699_p8), %s258_s11, 128, %s260_s10, %s245_s13  }
  0x27   : > { %s278_s23 = sshll.u32 %s270_s19, 4  ;;  %s266_s20 = sand.u32 1, %s2951_s26   ;;  %s279_s23 = int_to_ptr.vmem [resolvable:$true] %s278_s23 }
  0x28   : > { %s275_s8 = scalar_lea.hbm %s4641_s1, %s2683_s2  ;;  %s267_s29 = scalar_lea.sflag [#allocation6], %s266_s20 }
  0x29   : > { %s276_s30 = sshll.u32 %s275_s8, 4  ;;  %s4712_s9 = smov 8   ;;  %s277_s30 = int_to_ptr.hbm [resolvable:$true] %s276_s30 }
  0x2a   : > { %s4713_s12 = smov 128   ;;  %290 = sbr.rel (%p3030_p3) target bundleno = 760 (0x2f8), region = 44 }
  0x2b   : > { %2704 = dma.hbm_to_vmem [thread:$0]  (!%p2699_p8), %s277_s30, 8192, %s279_s23, %s267_s29, %s4713_s12, %s4713_s12, %s4712_s9  }
  0x2f   : > { %s3095_s10 = sand.u32 1, %s2935_s22  }
  0x30   : > { %s2674_s11 = sshll.u32 %s3095_s10, 3  ;;  %s293_s13 = scalar_lea.sflag [#allocation3], %s3095_s10 }
  0x31   : > { %s3099_s5 = scalar_lea.vmem [#allocation2], %s2674_s11 }
  0x32   : > { %2914 = dma.done.wait (%p3058_p12), %s293_s13, 128  }
  0x33   : > { %2916 = vsyncadd (%p3058_p12), %s293_s13, 4294967168  ;;  %s302_s2 = sand.u32 1, %s3022_s27   ;;  %s2675_s21 = sshll.u32 %s3095_s10, 9 }
  0x34   : > { %s303_s23 = scalar_lea.sflag [#allocation6], %s302_s2  ;;  %s3107_s7 = scalar_lea.vmem [#allocation5], %s2675_s21 }
  0x35   : > { %2918 = dma.done.wait (%p3058_p12), %s303_s23, 8192  }
  0x36   : > { %2920 = vsyncadd (%p3058_p12), %s303_s23, 4294959104 }
  0x37   : > { %2922 = dma.done.wait (%p60_p1), [#allocation6], 2048  }
  0x38   : > { %2924 = vsyncadd (%p60_p1), [#allocation6], 4294965248  ;;  %v362_v0 = vld [vmem:[%s3107_s7 + $0x78] sm:$0xff]  ;;  %v361_v1 = vld [vmem:[%s3107_s7 + $0x70] sm:$0xff]  ;;  %s2677_s16 = sshll.u32 %s3095_s10, 1  ;;  %s2679_s19 = sshll.u32 %s2943_s24, 1 }
  0x39   : > { %v360_v2 = vld [vmem:[%s3107_s7 + $0x68] sm:$0xff]  ;;  %v3120_v3 = vand.u32 4294901760, %v362_v0  ;;  %v3122_v4 = vand.u32 4294901760, %v361_v1  ;;  %v359_v6 = vld [vmem:[%s3107_s7 + $0x60] sm:$0xff]  ;;  %v358_v7 = vld [vmem:[%s3107_s7 + $0x58] sm:$0xff]  ;;  %s2543_s8 = scalar_lea.hbm %s4646_s6, %s2679_s19  ;;  %s4789_s29 = sld [smem:[#allocation25_spill]] }
  0x3a   : > { %v3124_v5 = vand.u32 4294901760, %v360_v2  ;;  %v357_v8 = vld [vmem:[%s3107_s7 + $0x50] sm:$0xff]  ;;  %v3129_v9 = vand.u32 4294901760, %v359_v6  ;;  %v3131_v10 = vand.u32 4294901760, %v358_v7  ;;  %v356_v12 = vld [vmem:[%s3107_s7 + $0x48] sm:$0xff]  ;;  %v355_v13 = vld [vmem:[%s3107_s7 + $0x40] sm:$0xff] }
  0x3b   : > { %v3133_v11 = vand.u32 4294901760, %v357_v8  ;;  %426 = vmatpush.msra.mxu0 %v3120_v3  ;;  %v3139_v14 = vsub.f32 %v362_v0, %v3120_v3  ;;  %v3142_v15 = vsub.f32 %v361_v1, %v3122_v4  ;;  %622 = vmatpush.msra.mxu3 %v3120_v3  ;;  %v3148_v17 = vand.u32 4294901760, %v356_v12  ;;  %v354_v21 = vld [vmem:[%s3107_s7 + $0x38] sm:$0xff]  ;;  %v353_v26 = vld [vmem:[%s3107_s7 + $0x30] sm:$0xff]  ;;  %v352_v34 = vld [vmem:[%s3107_s7 + $0x28] sm:$0xff]  ;;  %s345_s9 = scalar_lea.vmem [#allocation8], %s2677_s16 }
  0x3c   : > { %v3146_v16 = vsub.f32 %v360_v2, %v3124_v5  ;;  %v3151_v18 = vsub.f32 %v359_v6, %v3129_v9  ;;  %v3154_v19 = vsub.f32 %v358_v7, %v3131_v10  ;;  %v3165_v25 = vand.u32 4294901760, %v355_v13  ;;  %v351_v42 = vld [vmem:[%s3107_s7 + $0x20] sm:$0xff]  ;;  %v350_v47 = vld [vmem:[%s3107_s7 + $0x18] sm:$0xff]  ;;  %v349_v54 = vld [vmem:[%s3107_s7 + $0x10] sm:$0xff]  ;;  %s2545_s12 = sshll.u32 %s345_s9, 4  ;;  %s2547_s11 = sshll.u32 %s2543_s8, 4  ;;  %s2546_s12 = int_to_ptr.vmem [resolvable:$true] %s2545_s12  ;;  %s2548_s11 = int_to_ptr.hbm [resolvable:$true] %s2547_s11 }
  0x3d   : > { %v3157_v20 = vsub.f32 %v357_v8, %v3133_v11  ;;  %428 = vmatpush.msra.mxu0 %v3122_v4  ;;  %569 = vmatpush.msra.mxu2 %v3139_v14  ;;  %v468_v22 = vand.u32 4294901760, %v3139_v14  ;;  %v4668_v23 = vand.u32 4294901760, %v3142_v15  ;;  %v3172_v29 = vsub.f32 %v356_v12, %v3148_v17  ;;  %v346_v55 = vld [vmem:[%s3099_s5] sm:$0xff]  ;;  %v348_v62 = vld [vmem:[%s3107_s7 + $0x8] sm:$0xff]  ;;  %v347_v6 = vld [vmem:[%s3107_s7] sm:$0xff]  ;;  %s2532_s13 = scalar_lea.sflag [#allocation4], %s3095_s10 }
  0x3e   : > { %v4666_v24 = vand.u32 4294901760, %v3146_v16  ;;  %624 = vmatpush.msra.mxu3 %v3122_v4  ;;  %v4665_v27 = vand.u32 4294901760, %v3151_v18  ;;  %v4662_v28 = vand.u32 4294901760, %v3154_v19  ;;  %v3185_v33 = vand.u32 4294901760, %v354_v21  ;;  %v378_v60 = vld [vmem:[%s3107_s7 + $0xf8] sm:$0xff]  ;;  %v377_v7 = vld [vmem:[%s3107_s7 + $0xf0] sm:$0xff] }
  0x3f   : > { %430 = vmatpush.msra.mxu0 %v3124_v5  ;;  %572 = vmatpush.msra.mxu2 %v3142_v15  ;;  %v469_v30 = vsub.f32 %v3139_v14, %v468_v22  ;;  %v475_v31 = vsub.f32 %v3142_v15, %v4668_v23  ;;  %v3189_v35 = vand.u32 4294901760, %v353_v26  ;;  %v4660_v36 = vand.u32 4294901760, %v3157_v20  ;;  %416 = vst [vmem:[#allocation1] ss:$4 sm:$0xff] %v346_v55  ;;  %s2875_s5 = sshra.s32 %s2548_s11, 4  ;;  %s2876_s5 = int_to_ptr.hbm [resolvable:$true] %s2875_s5 }
  0x40   : > { %v481_v32 = vsub.f32 %v3146_v16, %v4666_v24  ;;  %626 = vmatpush.msra.mxu3 %v3124_v5  ;;  %v487_v39 = vsub.f32 %v3151_v18, %v4665_v27  ;;  %v3198_v40 = vsub.f32 %v355_v13, %v3165_v25  ;;  %v493_v41 = vsub.f32 %v3154_v19, %v4662_v28  ;;  %s2877_s2 = scalar_lea.hbm %s2876_s5, 2  ;;  %p2882_p10 = scmp.lt.s32.totalorder %s2876_s5, %s4646_s6 }
  0x41   : > { %432 = vmatpush.msra.mxu0 %v3129_v9  ;;  %v470_v37 = vand.u32 4294901760, %v469_v30  ;;  %575 = vmatpush.msra.mxu2 %v3146_v16  ;;  %v476_v38 = vand.u32 4294901760, %v475_v31  ;;  %v3206_v44 = vand.u32 4294901760, %v352_v34  ;;  %v4659_v45 = vand.u32 4294901760, %v3172_v29  ;;  %p2878_p1 = scmp.ne.s32.totalorder %s2876_s5, %s2877_s2 }
  0x42   : > { %628 = vmatpush.msra.mxu3 %v3129_v9  ;;  %v482_v43 = vand.u32 4294901760, %v481_v32  ;;  %v3210_v46 = vsub.f32 %v354_v21, %v3185_v33  ;;  %v499_v48 = vsub.f32 %v3157_v20, %v4660_v36  ;;  %v488_v49 = vand.u32 4294901760, %v487_v39 }
  0x43   : > { %434 = vmatpush.msra.mxu0 %v3131_v10  ;;  %471 = vmatpush.msra.mxu1 %v470_v37  ;;  %v3219_v50 = vand.u32 4294901760, %v351_v42  ;;  %v4658_v51 = vand.u32 4294901760, %v3198_v40  ;;  %v3223_v52 = vsub.f32 %v353_v26, %v3189_v35  ;;  %v3227_v53 = vand.u32 4294901760, %v350_v47  ;;  %p2879_p3 = pnand %p2878_p1, %p3065_p4 }
  0x44   : > { %578 = vmatpush.msra.mxu2 %v3151_v18  ;;  %630 = vmatpush.msra.mxu3 %v3131_v10  ;;  %v494_v56 = vand.u32 4294901760, %v493_v41  ;;  %v505_v57 = vsub.f32 %v3172_v29, %v4659_v45  ;;  %v4657_v58 = vand.u32 4294901760, %v3210_v46  ;;  %v3237_v59 = vsub.f32 %v352_v34, %v3206_v44  ;;  %v376_v34 = vld [vmem:[%s3107_s7 + $0xe8] sm:$0xff]  ;;  %v371_v45 = vld [vmem:[%s3107_s7 + $0xc0] sm:$0xff] }
  0x45   : > { %436 = vmatpush.msra.mxu0 %v3133_v11  ;;  %477 = vmatpush.msra.mxu1 %v476_v38  ;;  %v500_v61 = vand.u32 4294901760, %v499_v48  ;;  %v511_v63 = vsub.f32 %v3198_v40, %v4658_v51  ;;  %v3247_v0 = vand.u32 4294901760, %v349_v54  ;;  %v4656_v1 = vand.u32 4294901760, %v3223_v52  ;;  %p2880_p9 = pneg %p2879_p3 }
  0x46   : > { %581 = vmatpush.msra.mxu2 %v3154_v19  ;;  %632 = vmatpush.msra.mxu3 %v3133_v11  ;;  %v3251_v2 = vsub.f32 %v351_v42, %v3219_v50  ;;  %v3258_v8 = vsub.f32 %v350_v47, %v3227_v53  ;;  %v3260_v12 = vand.u32 4294901760, %v378_v60  ;;  %v506_v13 = vand.u32 4294901760, %v505_v57  ;;  %v375_v47 = vld [vmem:[%s3107_s7 + $0xe0] sm:$0xff] }
  0x47   : > { %438 = vmatpush.msra.mxu0 %v3148_v17  ;;  %483 = vmatpush.msra.mxu1 %v482_v43  ;;  %v517_v21 = vsub.f32 %v3210_v46, %v4657_v58  ;;  %v3266_v26 = vand.u32 4294901760, %v348_v62  ;;  %v4654_v30 = vand.u32 4294901760, %v3237_v59  ;;  %v3271_v31 = vand.u32 4294901760, %v347_v6  ;;  %v372_v58 = vld [vmem:[%s3107_s7 + $0xc8] sm:$0xff] }
  0x48   : > { %584 = vmatpush.msra.mxu2 %v3157_v20  ;;  %634 = vmatpush.msra.mxu3 %v3148_v17  ;;  %v3273_v32 = vand.u32 4294901760, %v377_v7  ;;  %v512_v37 = vand.u32 4294901760, %v511_v63  ;;  %v523_v38 = vsub.f32 %v3223_v52, %v4656_v1  ;;  %v4653_v39 = vand.u32 4294901760, %v3251_v2 }
  0x49   : > { %440 = vmatpush.msra.mxu0 %v3165_v25  ;;  %489 = vmatpush.msra.mxu1 %v488_v49  ;;  %4714 = vst [vmem:[#allocation18_spill] sm:$0xff] %v3271_v31  ;;  %v3282_v41 = vsub.f32 %v349_v54, %v3247_v0  ;;  %v4655_v42 = vand.u32 4294901760, %v3258_v8  ;;  %v3288_v43 = vsub.f32 %v378_v60, %v3260_v12  ;;  %v518_v48 = vand.u32 4294901760, %v517_v21  ;;  %v374_v60 = vld [vmem:[%s3107_s7 + $0xd8] sm:$0xff]  ;;  %v373_v21 = vld [vmem:[%s3107_s7 + $0xd0] sm:$0xff] }
  0x4a   : > { %587 = vmatpush.msra.mxu2 %v3172_v29  ;;  %636 = vmatpush.msra.mxu3 %v3165_v25  ;;  %v529_v49 = vsub.f32 %v3237_v59, %v4654_v30  ;;  %v3296_v54 = vsub.f32 %v348_v62, %v3266_v26  ;;  %v3298_v55 = vand.u32 4294901760, %v376_v34  ;;  %v3306_v57 = vsub.f32 %v377_v7, %v3273_v32 }
  0x4b   : > { %442 = vmatpush.msra.mxu0 %v3185_v33  ;;  %495 = vmatpush.msra.mxu1 %v494_v56  ;;  %v3303_v56 = vsub.f32 %v347_v6, %v3271_v31  ;;  %v535_v62 = vsub.f32 %v3251_v2, %v4653_v39  ;;  %v4661_v63 = vand.u32 4294901760, %v3282_v41  ;;  %v541_v6 = vsub.f32 %v3258_v8, %v4655_v42 }
  0x4c   : > { %590 = vmatpush.msra.mxu2 %v3198_v40  ;;  %638 = vmatpush.msra.mxu3 %v3185_v33  ;;  %v4663_v7 = vand.u32 4294901760, %v3288_v43  ;;  %v3326_v39 = vsub.f32 %v376_v34, %v3298_v55  ;;  %v3328_v30 = vand.u32 4294901760, %v374_v60  ;;  %v4667_v1 = vand.u32 4294901760, %v3306_v57 }
  0x4d   : > { %444 = vmatpush.msra.mxu0 %v3189_v35  ;;  %501 = vmatpush.msra.mxu1 %v500_v61  ;;  %v524_v61 = vand.u32 4294901760, %v523_v38  ;;  %v4664_v38 = vand.u32 4294901760, %v3296_v54  ;;  %v4669_v42 = vand.u32 4294901760, %v3303_v56  ;;  %v547_v34 = vsub.f32 %v3282_v41, %v4661_v63 }
  0x4e   : > { %593 = vmatpush.msra.mxu2 %v3210_v46  ;;  %640 = vmatpush.msra.mxu3 %v3189_v35  ;;  %v3342_v51 = vand.u32 4294901760, %v373_v21  ;;  %v542_v36 = vand.u32 4294901760, %v541_v6  ;;  %v3356_v63 = vsub.f32 %v374_v60, %v3328_v30  ;;  %v3358_v28 = vand.u32 4294901760, %v372_v58  ;;  %v370_v6 = vld [vmem:[%s3107_s7 + $0xb8] sm:$0xff] }
  0x4f   : > { %446 = vmatpush.msra.mxu0 %v3206_v44  ;;  %507 = vmatpush.msra.mxu1 %v506_v13  ;;  %v3314_v13 = vand.u32 4294901760, %v375_v47  ;;  %v559_v60 = vsub.f32 %v3303_v56, %v4669_v42  ;;  %v3379_v23 = vand.u32 4294901760, %v370_v6 }
  0x50   : > { %596 = vmatpush.msra.mxu2 %v3223_v52  ;;  %642 = vmatpush.msra.mxu3 %v3206_v44  ;;  %v3374_v24 = vsub.f32 %v373_v21, %v3342_v51  ;;  %v3388_v14 = vsub.f32 %v372_v58, %v3358_v28 }
  0x51   : > { %448 = vmatpush.msra.mxu0 %v3219_v50  ;;  %513 = vmatpush.msra.mxu1 %v512_v37  ;;  %v530_v37 = vand.u32 4294901760, %v529_v49  ;;  %v3340_v49 = vsub.f32 %v375_v47, %v3314_v13  ;;  %v553_v47 = vsub.f32 %v3296_v54, %v4664_v38  ;;  %v548_v38 = vand.u32 4294901760, %v547_v34 }
  0x52   : > { %599 = vmatpush.msra.mxu2 %v3237_v59  ;;  %644 = vmatpush.msra.mxu3 %v3219_v50 }
  0x53   : > { %450 = vmatpush.msra.mxu0 %v3227_v53  ;;  %519 = vmatpush.msra.mxu1 %v518_v48  ;;  %v536_v48 = vand.u32 4294901760, %v535_v62  ;;  %v4670_v62 = vand.u32 4294901760, %v3326_v39  ;;  %v4671_v27 = vand.u32 4294901760, %v3340_v49  ;;  %v554_v34 = vand.u32 4294901760, %v553_v47  ;;  %v368_v47 = vld [vmem:[%s3107_s7 + $0xa8] sm:$0xff] }
  0x54   : > { %602 = vmatpush.msra.mxu2 %v3251_v2  ;;  %646 = vmatpush.msra.mxu3 %v3227_v53 }
  0x55   : > { %452 = vmatpush.msra.mxu0 %v3247_v0  ;;  %525 = vmatpush.msra.mxu1 %v524_v61  ;;  %v810_v61 = vsub.f32 %v3288_v43, %v4663_v7  ;;  %v3366_v7 = vand.u32 4294901760, %v371_v45  ;;  %v822_v42 = vsub.f32 %v3326_v39, %v4670_v62  ;;  %v560_v62 = vand.u32 4294901760, %v559_v60 }
  0x56   : > { %605 = vmatpush.msra.mxu2 %v3258_v8  ;;  %648 = vmatpush.msra.mxu3 %v3247_v0  ;;  %v828_v21 = vsub.f32 %v3340_v49, %v4671_v27  ;;  %v4717_v60 = vand.u32 4294901760, %v3356_v63 }
  0x57   : > { %454 = vmatpush.msra.mxu0 %v3266_v26  ;;  %531 = vmatpush.msra.mxu1 %v530_v37  ;;  %v816_v37 = vsub.f32 %v3306_v57, %v4667_v1  ;;  %v811_v1 = vand.u32 4294901760, %v810_v61 }
  0x58   : > { %608 = vmatpush.msra.mxu2 %v3282_v41  ;;  %650 = vmatpush.msra.mxu3 %v3266_v26  ;;  %v834_v27 = vsub.f32 %v3356_v63, %v4717_v60 }
  0x59   : > { %456 = vmatpush.msra.mxu0 %v3271_v31  ;;  %537 = vmatpush.msra.mxu1 %v536_v48  ;;  %v369_v48 = vld [vmem:[%s3107_s7 + $0xb0] sm:$0xff]  ;;  %v817_v61 = vand.u32 4294901760, %v816_v37  ;;  %v823_v37 = vand.u32 4294901760, %v822_v42  ;;  %v4719_v42 = vand.u32 4294901760, %v3374_v24 }
  0x5a   : > { %611 = vmatpush.msra.mxu2 %v3296_v54  ;;  %652 = vmatpush.msra.mxu3 %v3271_v31  ;;  %v3415_v31 = vand.u32 4294901760, %v368_v47 }
  0x5b   : > { %663 = vmatpush.msrb.mxu0 %v468_v22  ;;  %543 = vmatpush.msra.mxu1 %v542_v36  ;;  %v4715_v22 = vand.u32 4294901760, %v3142_v15  ;;  %v3394_v36 = vsub.f32 %v371_v45, %v3366_v7  ;;  %v3402_v15 = vand.u32 4294901760, %v369_v48  ;;  %v3407_v45 = vsub.f32 %v370_v6, %v3379_v23  ;;  %v366_v6 = vld [vmem:[%s3107_s7 + $0x98] sm:$0xff] }
  0x5c   : > { %614 = vmatpush.msra.mxu2 %v3303_v56  ;;  %812 = vmatpush.msrb.mxu3 %v811_v1  ;;  %v3441_v1 = vand.u32 4294901760, %v366_v6 }
  0x5d   : > { %667 = vmatpush.msrb.mxu0 %v4715_v22  ;;  %549 = vmatpush.msra.mxu1 %v548_v38  ;;  %v4716_v22 = vand.u32 4294901760, %v3146_v16  ;;  %v367_v38 = vld [vmem:[%s3107_s7 + $0xa0] sm:$0xff]  ;;  %v4718_v16 = vand.u32 4294901760, %v3151_v18  ;;  %v3426_v60 = vsub.f32 %v369_v48, %v3402_v15  ;;  %v4720_v18 = vand.u32 4294901760, %v3154_v19 }
  0x5e   : > { %767 = vmatpush.msrb.mxu2 %v3260_v12  ;;  %818 = vmatpush.msrb.mxu3 %v817_v61  ;;  %v3428_v58 = vand.u32 4294901760, %v367_v38  ;;  %v417_v61 = vld.sshfl [vmem:[#allocation1] sm:$0xff pattern:$0x73625140]  ;;  %v3439_v48 = vsub.f32 %v368_v47, %v3415_v31  ;;  %v4722_v19 = vand.u32 4294901760, %v3157_v20  ;;  %v4724_v20 = vand.u32 4294901760, %v3172_v29 }
  0x5f   : > { %671 = vmatpush.msrb.mxu0 %v4716_v22  ;;  %555 = vmatpush.msra.mxu1 %v554_v34  ;;  %v829_v34 = vand.u32 4294901760, %v828_v21  ;;  %v840_v22 = vsub.f32 %v3374_v24, %v4719_v42  ;;  %v835_v21 = vand.u32 4294901760, %v834_v27  ;;  %v365_v27 = vld [vmem:[%s3107_s7 + $0x90] sm:$0xff]  ;;  %v4726_v29 = vand.u32 4294901760, %v3198_v40 }
  0x60   : > { %769 = vmatpush.msrb.mxu2 %v3273_v32  ;;  %824 = vmatpush.msrb.mxu3 %v823_v37  ;;  %v3453_v47 = vsub.f32 %v367_v38, %v3428_v58  ;;  %v3466_v38 = vand.u32 4294901760, %v365_v27  ;;  %v4728_v40 = vand.u32 4294901760, %v3210_v46  ;;  %v4730_v46 = vand.u32 4294901760, %v3223_v52 }
  0x61   : > { %675 = vmatpush.msrb.mxu0 %v4718_v16  ;;  %561 = vmatpush.msra.mxu1 %v560_v62  ;;  %v4721_v16 = vand.u32 4294901760, %v3388_v14  ;;  %v3455_v62 = vand.u32 4294901760, %v417_v61 }
  0x62   : > { %771 = vmatpush.msrb.mxu2 %v3298_v55  ;;  %830 = vmatpush.msrb.mxu3 %v829_v34 }
  0x63   : > { %679 = vmatpush.msrb.mxu0 %v4720_v18  ;;  %730 = vmatpush.msrb.mxu1 %v3120_v3  ;;  %v846_v42 = vsub.f32 %v3388_v14, %v4721_v16  ;;  %v4723_v3 = vand.u32 4294901760, %v3394_v36  ;;  %v841_v18 = vand.u32 4294901760, %v840_v22  ;;  %v3469_v16 = vsub.f32 %v366_v6, %v3441_v1 }
  0x64   : > { %773 = vmatpush.msrb.mxu2 %v3314_v13  ;;  %836 = vmatpush.msrb.mxu3 %v835_v21  ;;  %v4727_v21 = vand.u32 4294901760, %v3426_v60  ;;  %v3481_v22 = vsub.f32 %v417_v61, %v3455_v62  ;;  %v3494_v61 = vsub.f32 %v365_v27, %v3466_v38 }
  0x65   : > { %683 = vmatpush.msrb.mxu0 %v4722_v19  ;;  %732 = vmatpush.msrb.mxu1 %v3122_v4  ;;  %v852_v37 = vsub.f32 %v3394_v36, %v4723_v3  ;;  %v4725_v4 = vand.u32 4294901760, %v3407_v45  ;;  %v364_v3 = vld [vmem:[%s3107_s7 + $0x88] sm:$0xff]  ;;  %v847_v34 = vand.u32 4294901760, %v846_v42 }
  0x66   : > { %775 = vmatpush.msrb.mxu2 %v3328_v30  ;;  %842 = vmatpush.msrb.mxu3 %v841_v18  ;;  %v864_v42 = vsub.f32 %v3426_v60, %v4727_v21  ;;  %v3483_v6 = vand.u32 4294901760, %v364_v3 }
  0x67   : > { %687 = vmatpush.msrb.mxu0 %v4724_v20  ;;  %734 = vmatpush.msrb.mxu1 %v3124_v5  ;;  %v858_v19 = vsub.f32 %v3407_v45, %v4725_v4  ;;  %v853_v5 = vand.u32 4294901760, %v852_v37  ;;  %v363_v20 = vld [vmem:[%s3107_s7 + $0x80] sm:$0xff]  ;;  %v875_v4 = vand.u32 4294901760, %v3453_v47  ;;  %v4729_v37 = vand.u32 4294901760, %v3439_v48 }
  0x68   : > { %777 = vmatpush.msrb.mxu2 %v3342_v51  ;;  %848 = vmatpush.msrb.mxu3 %v847_v34  ;;  %v3496_v21 = vand.u32 4294901760, %v363_v20  ;;  %v459_v34 = vand.u32 4294901760, %v3481_v22  ;;  %v3507_v27 = vsub.f32 %v364_v3, %v3483_v6  ;;  %v4732_v3 = vand.u32 4294901760, %v3251_v2 }
  0x69   : > { %691 = vmatpush.msrb.mxu0 %v4726_v29  ;;  %736 = vmatpush.msrb.mxu1 %v3129_v9  ;;  %v859_v9 = vand.u32 4294901760, %v858_v19  ;;  %v870_v18 = vsub.f32 %v3439_v48, %v4729_v37  ;;  %v881_v29 = vand.u32 4294901760, %v3469_v16  ;;  %v876_v19 = vsub.f32 %v3453_v47, %v875_v4 }
  0x6a   : > { %779 = vmatpush.msrb.mxu2 %v3358_v28  ;;  %854 = vmatpush.msrb.mxu3 %v853_v5  ;;  %v887_v5 = vand.u32 4294901760, %v3494_v61  ;;  %v893_v37 = vand.u32 4294901760, %v3507_v27 }
  0x6b   : > { %695 = vmatpush.msrb.mxu0 %v4728_v40  ;;  %738 = vmatpush.msrb.mxu1 %v3131_v10  ;;  %v865_v10 = vand.u32 4294901760, %v864_v42  ;;  %v4731_v40 = vand.u32 4294901760, %v3237_v59  ;;  %v882_v52 = vsub.f32 %v3469_v16, %v881_v29  ;;  %v3518_v42 = vsub.f32 %v363_v20, %v3496_v21  ;;  %v418_v59 = vld.sshfl [vmem:[#allocation1 + $0x8] sm:$0xff pattern:$0x73625140] }
  0x6c   : > { %781 = vmatpush.msrb.mxu2 %v3366_v7  ;;  %860 = vmatpush.msrb.mxu3 %v859_v9  ;;  %v460_v9 = vsub.f32 %v3481_v22, %v459_v34 }
  0x6d   : > { %699 = vmatpush.msrb.mxu0 %v4730_v46  ;;  %740 = vmatpush.msrb.mxu1 %v3133_v11  ;;  %v871_v11 = vand.u32 4294901760, %v870_v18  ;;  %v4733_v18 = vand.u32 4294901760, %v3258_v8  ;;  %v883_v2 = vand.u32 4294901760, %v882_v52  ;;  %v899_v20 = vand.u32 4294901760, %v3518_v42 }
  0x6e   : > { %783 = vmatpush.msrb.mxu2 %v3379_v23  ;;  %866 = vmatpush.msrb.mxu3 %v865_v10  ;;  %v3534_v46 = vand.u32 4294901760, %v418_v59  ;;  %v4734_v10 = vand.u32 4294901760, %v3282_v41  ;;  %v894_v8 = vsub.f32 %v3507_v27, %v893_v37 }
  0x6f   : > { %703 = vmatpush.msrb.mxu0 %v4731_v40  ;;  %742 = vmatpush.msrb.mxu1 %v3148_v17  ;;  %v877_v17 = vand.u32 4294901760, %v876_v19  ;;  %v4735_v19 = vand.u32 4294901760, %v3296_v54 }
  0x70   : > { %785 = vmatpush.msrb.mxu2 %v3402_v15  ;;  %872 = vmatpush.msrb.mxu3 %v871_v11  ;;  %v3551_v40 = vsub.f32 %v418_v59, %v3534_v46  ;;  %v4736_v11 = vand.u32 4294901760, %v3303_v56  ;;  %v4739_v56 = vld [vmem:[#allocation18_spill] sm:$0xff] }
  0x71   : > { %707 = vmatpush.msrb.mxu0 %v4732_v3  ;;  %744 = vmatpush.msrb.mxu1 %v3165_v25  ;;  %v888_v25 = vsub.f32 %v3494_v61, %v887_v5 }
  0x72   : > { %787 = vmatpush.msrb.mxu2 %v3415_v31  ;;  %878 = vmatpush.msrb.mxu3 %v877_v17  ;;  %v800_v52 = vand.u32 4294901760, %v3551_v40 }
  0x73   : > { %711 = vmatpush.msrb.mxu0 %v4733_v18  ;;  %746 = vmatpush.msrb.mxu1 %v3185_v33  ;;  %v461_v33 = vand.u32 4294901760, %v460_v9  ;;  %v889_v41 = vand.u32 4294901760, %v888_v25  ;;  %v385_v9 = vld [vmem:[%s3107_s7 + $0x130] sm:$0xff] }
  0x74   : > { %789 = vmatpush.msrb.mxu2 %v3428_v58  ;;  %884 = vmatpush.msrb.mxu3 %v883_v2 }
  0x75   : > { %715 = vmatpush.msrb.mxu0 %v4734_v10  ;;  %748 = vmatpush.msrb.mxu1 %v3189_v35  ;;  %v900_v35 = vsub.f32 %v3518_v42, %v899_v20 }
  0x76   : > { %791 = vmatpush.msrb.mxu2 %v3441_v1  ;;  %462 = vmatmul.f32.vlgmr.msra.gmra.mxu0 %v461_v33  ;;  %v3730_v33 = vand.u32 4294901760, %v385_v9 }
  0x77   : > { %719 = vmatpush.msrb.mxu0 %v4735_v19  ;;  %750 = vmatpush.msrb.mxu1 %v3206_v44  ;;  %v895_v44 = vand.u32 4294901760, %v894_v8  ;;  %v901_v54 = vand.u32 4294901760, %v900_v35  ;;  %v383_v19 = vld [vmem:[%s3107_s7 + $0x120] sm:$0xff] }
  0x78   : > { %793 = vmatpush.msrb.mxu2 %v3466_v38  ;;  %890 = vmatpush.msrb.mxu3 %v889_v41 }
  0x79   : > { %723 = vmatpush.msrb.mxu0 %v4736_v11  ;;  %752 = vmatpush.msrb.mxu1 %v3219_v50  ;;  %v4737_v50 = vand.u32 4294901760, %v3288_v43 }
  0x7a   : > { %795 = vmatpush.msrb.mxu2 %v3483_v6  ;;  %896 = vmatpush.msrb.mxu3 %v895_v44 }
  0x7b   : > { %910 = vmatpush.msra.mxu0 %v3288_v43  ;;  %754 = vmatpush.msrb.mxu1 %v3227_v53  ;;  %v801_v53 = vsub.f32 %v3551_v40, %v800_v52 }
  0x7c   : > { %797 = vmatpush.msrb.mxu2 %v3496_v21  ;;  %902 = vmatpush.msrb.mxu3 %v901_v54 }
  0x7d   : > { %913 = vmatpush.msra.mxu0 %v3306_v57  ;;  %756 = vmatpush.msrb.mxu1 %v3247_v0  ;;  %v4738_v0 = vand.u32 4294901760, %v3306_v57  ;;  %v802_v43 = vand.u32 4294901760, %v801_v53  ;;  %v4741_v57 = vand.u32 4294901760, %v3340_v49  ;;  %v3756_v53 = vand.u32 4294901760, %v383_v19 }
  0x7e   : > { %617 = vmatmul.f32.vlgmr.msra.gmra.mxu2 %v3481_v22  ;;  %656 = vmatmul.f32.vlgmr.msra.gmra.mxu3 %v459_v34 }
  0x7f   : > { %916 = vmatpush.msra.mxu0 %v3326_v39  ;;  %1004 = vmatpush.msra.mxu2 %v4737_v50 }
  0x80   : > { %758 = vmatpush.msrb.mxu1 %v3266_v26  ;;  %1071 = vmatpush.msra.mxu3 %v3260_v12  ;;  %v4740_v26 = vand.u32 4294901760, %v3326_v39  ;;  %v4742_v39 = vand.u32 4294901760, %v3356_v63 }
  0x81   : > { %919 = vmatpush.msra.mxu0 %v3340_v49  ;;  %1008 = vmatpush.msra.mxu2 %v4738_v0  ;;  %v4748_v49 = vand.u32 4294901760, %v3439_v48 }
  0x82   : > { %760 = vmatpush.msrb.mxu1 %v4739_v56  ;;  %1073 = vmatpush.msra.mxu3 %v3273_v32  ;;  %v3760_v56 = vsub.f32 %v385_v9, %v3730_v33 }
  0x83   : > { %922 = vmatpush.msra.mxu0 %v3356_v63  ;;  %563 = vmatmul.f32.vlgmr.msra.gmra.mxu1 %v3455_v62  ;;  %v4747_v63 = vand.u32 4294901760, %v3426_v60 }
  0x84   : > { %1012 = vmatpush.msra.mxu2 %v4740_v26  ;;  %963 = vmatpush.msra.mxu1 %v3260_v12  ;;  %v4743_v12 = vand.u32 4294901760, %v3374_v24 }
  0x85   : > { %925 = vmatpush.msra.mxu0 %v3374_v24  ;;  %1075 = vmatpush.msra.mxu3 %v3298_v55  ;;  %v4745_v24 = vand.u32 4294901760, %v3394_v36 }
  0x86   : > { %1016 = vmatpush.msra.mxu2 %v4741_v57  ;;  %965 = vmatpush.msra.mxu1 %v3273_v32  ;;  %v4744_v32 = vand.u32 4294901760, %v3388_v14 }
  0x87   : > { %803 = vmatmul.f32.vlgmr.msrb.gmra.mxu2 %v802_v43  ;;  %928 = vmatpush.msra.mxu0 %v3388_v14  ;;  %v391_v14 = vld [vmem:[%s3107_s7 + $0x160] sm:$0xff]  ;;  %v381_v43 = vld [vmem:[%s3107_s7 + $0x110] sm:$0xff] }
  0x88   : > { %967 = vmatpush.msra.mxu1 %v3298_v55  ;;  %1020 = vmatpush.msra.mxu2 %v4742_v39  ;;  %v4746_v55 = vand.u32 4294901760, %v3407_v45 }
  0x89   : > { %1077 = vmatpush.msra.mxu3 %v3314_v13  ;;  %725 = vmatmul.f32.vlgmr.msrb.gmra.mxu0 %v3455_v62 }
  0x8a   : > { %904 = vmatmul.f32.vlgmr.msrb.gmra.mxu3 %v3534_v46  ;;  %931 = vmatpush.msra.mxu0 %v3394_v36 }
  0x8b   : > { %969 = vmatpush.msra.mxu1 %v3314_v13  ;;  %1024 = vmatpush.msra.mxu2 %v4743_v12 }
  0x8c   : > { %1079 = vmatpush.msra.mxu3 %v3328_v30  ;;  %762 = vmatmul.f32.vlgmr.msrb.gmra.mxu1 %v3455_v62  ;;  %v389_v62 = vld [vmem:[%s3107_s7 + $0x150] sm:$0xff] }
  0x8d   : > { %934 = vmatpush.msra.mxu0 %v3407_v45  ;;  %971 = vmatpush.msra.mxu1 %v3328_v30  ;;  %v394_v30 = vld [vmem:[%s3107_s7 + $0x178] sm:$0xff] }
  0x8e   : > { %1028 = vmatpush.msra.mxu2 %v4744_v32  ;;  %1081 = vmatpush.msra.mxu3 %v3342_v51  ;;  %v3622_v13 = vand.u32 4294901760, %v394_v30  ;;  %v390_v45 = vld [vmem:[%s3107_s7 + $0x158] sm:$0xff] }
  0x8f   : > { %937 = vmatpush.msra.mxu0 %v3426_v60  ;;  %973 = vmatpush.msra.mxu1 %v3342_v51  ;;  %v393_v51 = vld [vmem:[%s3107_s7 + $0x170] sm:$0xff] }
  0x90   : > { %1032 = vmatpush.msra.mxu2 %v4745_v24  ;;  %1083 = vmatpush.msra.mxu3 %v3358_v28  ;;  %v3641_v36 = vsub.f32 %v394_v30, %v3622_v13 }
  0x91   : > { %940 = vmatpush.msra.mxu0 %v3439_v48  ;;  %975 = vmatpush.msra.mxu1 %v3358_v28  ;;  %v392_v28 = vld [vmem:[%s3107_s7 + $0x168] sm:$0xff]  ;;  %v3657_v48 = vand.u32 4294901760, %v390_v45 }
  0x92   : > { %1036 = vmatpush.msra.mxu2 %v4746_v55  ;;  %1085 = vmatpush.msra.mxu3 %v3366_v7 }
  0x93   : > { %943 = vmatpush.msra.mxu0 %v3453_v47  ;;  %977 = vmatpush.msra.mxu1 %v3366_v7  ;;  %v3630_v7 = vand.u32 4294901760, %v393_v51  ;;  %v3668_v47 = vand.u32 4294901760, %v389_v62 }
  0x94   : > { %1040 = vmatpush.msra.mxu2 %v4747_v63  ;;  %1087 = vmatpush.msra.mxu3 %v3379_v23  ;;  %v4676_v63 = vand.u32 4294901760, %v3760_v56 }
  0x95   : > { %946 = vmatpush.msra.mxu0 %v3469_v16  ;;  %979 = vmatpush.msra.mxu1 %v3379_v23  ;;  %v3638_v23 = vand.u32 4294901760, %v392_v28  ;;  %v3652_v60 = vsub.f32 %v393_v51, %v3630_v7  ;;  %v3783_v51 = vand.u32 4294901760, %v381_v43 }
  0x96   : > { %1044 = vmatpush.msra.mxu2 %v4748_v49  ;;  %1089 = vmatpush.msra.mxu3 %v3402_v15  ;;  %v380_v49 = vld [vmem:[%s3107_s7 + $0x108] sm:$0xff] }
  0x97   : > { %949 = vmatpush.msra.mxu0 %v3494_v61  ;;  %981 = vmatpush.msra.mxu1 %v3402_v15  ;;  %v3649_v15 = vand.u32 4294901760, %v391_v14  ;;  %v3664_v16 = vsub.f32 %v392_v28, %v3638_v23  ;;  %v1156_v22 = vand.u32 4294901760, %v3652_v60  ;;  %v3787_v28 = vsub.f32 %v383_v19, %v3756_v53 }
  0x98   : > { %1048 = vmatpush.msra.mxu2 %v875_v4  ;;  %1091 = vmatpush.msra.mxu3 %v3415_v31 }
  0x99   : > { %952 = vmatpush.msra.mxu0 %v3507_v27  ;;  %983 = vmatpush.msra.mxu1 %v3415_v31  ;;  %v1150_v31 = vand.u32 4294901760, %v3641_v36  ;;  %v3676_v4 = vsub.f32 %v391_v14, %v3649_v15  ;;  %v1162_v27 = vand.u32 4294901760, %v3664_v16 }
  0x9a   : > { %1052 = vmatpush.msra.mxu2 %v881_v29  ;;  %1093 = vmatpush.msra.mxu3 %v3428_v58  ;;  %v387_v29 = vld [vmem:[%s3107_s7 + $0x140] sm:$0xff] }
  0x9b   : > { %955 = vmatpush.msra.mxu0 %v3518_v42  ;;  %985 = vmatpush.msra.mxu1 %v3428_v58  ;;  %v388_v58 = vld [vmem:[%s3107_s7 + $0x148] sm:$0xff]  ;;  %v1151_v61 = vsub.f32 %v3641_v36, %v1150_v31  ;;  %v1157_v42 = vsub.f32 %v3652_v60, %v1156_v22  ;;  %v3704_v3 = vand.u32 4294901760, %v387_v29  ;;  %v4685_v59 = vand.u32 4294901760, %v3676_v4 }
  0x9c   : > { %1056 = vmatpush.msra.mxu2 %v887_v5  ;;  %1095 = vmatpush.msra.mxu3 %v3441_v1  ;;  %v3690_v34 = vand.u32 4294901760, %v388_v58  ;;  %v386_v5 = vld [vmem:[%s3107_s7 + $0x138] sm:$0xff]  ;;  %v1163_v18 = vsub.f32 %v3664_v16, %v1162_v27 }
  0x9d   : > { %958 = vmatmul.f32.vlgmr.msra.gmra.mxu0 %v3551_v40  ;;  %987 = vmatpush.msra.mxu1 %v3441_v1  ;;  %v3681_v1 = vsub.f32 %v390_v45, %v3657_v48  ;;  %v3716_v2 = vand.u32 4294901760, %v386_v5  ;;  %v1169_v10 = vsub.f32 %v3676_v4, %v4685_v59  ;;  %v3733_v8 = vsub.f32 %v387_v29, %v3704_v3  ;;  %v419_v40 = vld.sshfl [vmem:[#allocation1 + $0x10] sm:$0xff pattern:$0x73625140] }
  0x9e   : > { %1108 = vmatpush.msrb.mxu0 %v3622_v13  ;;  %1060 = vmatpush.msra.mxu2 %v893_v37  ;;  %v1152_v37 = vand.u32 4294901760, %v1151_v61  ;;  %v3719_v25 = vsub.f32 %v388_v58, %v3690_v34  ;;  %v1164_v41 = vand.u32 4294901760, %v1163_v18  ;;  %v3765_v57 = vand.u32 4294901760, %v419_v40  ;;  %v410_v61 = vld [vmem:[%s3107_s7 + $0x1f8] sm:$0xff] }
  0x9f   : > { %1097 = vmatpush.msra.mxu3 %v3466_v38  ;;  %989 = vmatpush.msra.mxu1 %v3466_v38  ;;  %v3696_v38 = vsub.f32 %v389_v62, %v3668_v47  ;;  %v4683_v17 = vand.u32 4294901760, %v3681_v1  ;;  %v3747_v44 = vsub.f32 %v386_v5, %v3716_v2  ;;  %v1170_v50 = vand.u32 4294901760, %v1169_v10  ;;  %v402_v59 = vld [vmem:[%s3107_s7 + $0x1b8] sm:$0xff] }
  0xa0   : > { %1110 = vmatpush.msrb.mxu0 %v3630_v7  ;;  %1064 = vmatpush.msra.mxu2 %v899_v20  ;;  %v384_v20 = vld [vmem:[%s3107_s7 + $0x128] sm:$0xff]  ;;  %v4680_v11 = vand.u32 4294901760, %v3719_v25  ;;  %v4678_v0 = vand.u32 4294901760, %v3733_v8  ;;  %v3793_v14 = vsub.f32 %v419_v40, %v3765_v57  ;;  %v3806_v5 = vand.u32 4294901760, %v380_v49 }
  0xa1   : > { %1099 = vmatpush.msra.mxu3 %v3483_v6  ;;  %1066 = vmatmul.f32.vlgmr.msra.gmra.mxu2 %v3534_v46  ;;  %v3743_v35 = vand.u32 4294901760, %v384_v20  ;;  %v4677_v32 = vand.u32 4294901760, %v3747_v44  ;;  %v4673_v18 = vand.u32 4294901760, %v3787_v28  ;;  %v3820_v10 = vand.u32 4294901760, %v410_v61 }
  0xa2   : > { %1112 = vmatpush.msrb.mxu0 %v3638_v23  ;;  %1251 = vmatpush.msrb.mxu2 %v3641_v36  ;;  %v1187_v39 = vsub.f32 %v3719_v25, %v4680_v11  ;;  %v1193_v55 = vsub.f32 %v3733_v8, %v4678_v0 }
  0xa3   : > { %991 = vmatpush.msra.mxu1 %v3483_v6  ;;  %1101 = vmatpush.msra.mxu3 %v3496_v21  ;;  %v4681_v6 = vand.u32 4294901760, %v3696_v38  ;;  %v3775_v24 = vsub.f32 %v384_v20, %v3743_v35  ;;  %v1199_v62 = vsub.f32 %v3747_v44, %v4677_v32  ;;  %v3815_v20 = vsub.f32 %v381_v43, %v3783_v51 }
  0xa4   : > { %1103 = vmatmul.f32.vlgmr.msra.gmra.mxu3 %v3534_v46  ;;  %1114 = vmatpush.msrb.mxu0 %v3649_v15  ;;  %v1158_v46 = vand.u32 4294901760, %v1157_v42  ;;  %v1188_v45 = vand.u32 4294901760, %v1187_v39  ;;  %v379_v42 = vld [vmem:[%s3107_s7 + $0x100] sm:$0xff]  ;;  %v1194_v9 = vand.u32 4294901760, %v1193_v55  ;;  %v1217_v43 = vsub.f32 %v3787_v28, %v4673_v18 }
  0xa5   : > { %1254 = vmatpush.msrb.mxu2 %v3652_v60  ;;  %1304 = vmatpush.msrb.mxu3 %v3622_v13  ;;  %v1181_v54 = vsub.f32 %v3696_v38, %v4681_v6  ;;  %v4674_v58 = vand.u32 4294901760, %v3775_v24  ;;  %v1200_v19 = vand.u32 4294901760, %v1199_v62  ;;  %v3827_v40 = vand.u32 4294901760, %v379_v42  ;;  %v407_v55 = vld [vmem:[%s3107_s7 + $0x1e0] sm:$0xff]  ;;  %v401_v60 = vld [vmem:[%s3107_s7 + $0x1b0] sm:$0xff] }
  0xa6   : > { %993 = vmatpush.msra.mxu1 %v3496_v21  ;;  %1116 = vmatpush.msrb.mxu0 %v3657_v48  ;;  %v1175_v21 = vsub.f32 %v3681_v1, %v4683_v17  ;;  %v4679_v39 = vand.u32 4294901760, %v3815_v20  ;;  %v403_v17 = vld [vmem:[%s3107_s7 + $0x1c0] sm:$0xff] }
  0xa7   : > { %997 = vmatmul.f32.vlgmr.msra.gmra.mxu1 %v800_v52  ;;  %1257 = vmatpush.msrb.mxu2 %v3664_v16  ;;  %v382_v52 = vld [vmem:[%s3107_s7 + $0x118] sm:$0xff]  ;;  %v1182_v30 = vand.u32 4294901760, %v1181_v54 }
  0xa8   : > { %1153 = vmatpush.msrb.mxu1 %v1152_v37  ;;  %1306 = vmatpush.msrb.mxu3 %v3630_v7  ;;  %v1176_v26 = vand.u32 4294901760, %v1175_v21  ;;  %v3771_v12 = vand.u32 4294901760, %v382_v52  ;;  %v1205_v37 = vsub.f32 %v3760_v56, %v4676_v63  ;;  %v409_v21 = vld [vmem:[%s3107_s7 + $0x1f0] sm:$0xff] }
  0xa9   : > { %1118 = vmatpush.msrb.mxu0 %v3668_v47  ;;  %1260 = vmatpush.msrb.mxu2 %v3676_v4 }
  0xaa   : > { %1159 = vmatpush.msrb.mxu1 %v1158_v46  ;;  %1308 = vmatpush.msrb.mxu3 %v3638_v23  ;;  %v3801_v29 = vsub.f32 %v382_v52, %v3771_v12  ;;  %v1141_v46 = vand.u32 4294901760, %v3793_v14  ;;  %v3833_v52 = vsub.f32 %v380_v49, %v3806_v5 }
  0xab   : > { %1120 = vmatpush.msrb.mxu0 %v3690_v34  ;;  %1263 = vmatpush.msrb.mxu2 %v3681_v1 }
  0xac   : > { %1165 = vmatpush.msrb.mxu1 %v1164_v41  ;;  %1310 = vmatpush.msrb.mxu3 %v3649_v15  ;;  %v1211_v41 = vsub.f32 %v3775_v24, %v4674_v58  ;;  %v4675_v54 = vand.u32 4294901760, %v3801_v29  ;;  %v1142_v49 = vsub.f32 %v3793_v14, %v1141_v46  ;;  %v406_v58 = vld [vmem:[%s3107_s7 + $0x1d8] sm:$0xff] }
  0xad   : > { %1122 = vmatpush.msrb.mxu0 %v3704_v3  ;;  %1266 = vmatpush.msrb.mxu2 %v3696_v38  ;;  %v3877_v0 = vand.u32 4294901760, %v406_v58 }
  0xae   : > { %1171 = vmatpush.msrb.mxu1 %v1170_v50  ;;  %1312 = vmatpush.msrb.mxu3 %v3657_v48  ;;  %v408_v50 = vld [vmem:[%s3107_s7 + $0x1e8] sm:$0xff]  ;;  %v1212_v62 = vand.u32 4294901760, %v1211_v41  ;;  %v1218_v41 = vand.u32 4294901760, %v1217_v43  ;;  %v1143_v63 = vand.u32 4294901760, %v1142_v49 }
  0xaf   : > { %1124 = vmatpush.msrb.mxu0 %v3716_v2  ;;  %1269 = vmatpush.msrb.mxu2 %v3719_v25  ;;  %v3859_v18 = vand.u32 4294901760, %v408_v50 }
  0xb0   : > { %1177 = vmatpush.msrb.mxu1 %v1176_v26  ;;  %1314 = vmatpush.msrb.mxu3 %v3668_v47  ;;  %v1206_v26 = vand.u32 4294901760, %v1205_v37  ;;  %v3857_v37 = vsub.f32 %v379_v42, %v3827_v40  ;;  %v1229_v42 = vsub.f32 %v3815_v20, %v4679_v39 }
  0xb1   : > { %1126 = vmatpush.msrb.mxu0 %v3730_v33  ;;  %1272 = vmatpush.msrb.mxu2 %v3733_v8 }
  0xb2   : > { %1183 = vmatpush.msrb.mxu1 %v1182_v30  ;;  %1316 = vmatpush.msrb.mxu3 %v3690_v34  ;;  %v3841_v30 = vand.u32 4294901760, %v409_v21  ;;  %v4686_v39 = vand.u32 4294901760, %v3857_v37 }
  0xb3   : > { %1128 = vmatpush.msrb.mxu0 %v3743_v35  ;;  %1275 = vmatpush.msrb.mxu2 %v3747_v44 }
  0xb4   : > { %1189 = vmatpush.msrb.mxu1 %v1188_v45  ;;  %1318 = vmatpush.msrb.mxu3 %v3704_v3  ;;  %v3850_v45 = vsub.f32 %v410_v61, %v3820_v10  ;;  %v4682_v61 = vand.u32 4294901760, %v3833_v52 }
  0xb5   : > { %1130 = vmatpush.msrb.mxu0 %v3756_v53  ;;  %1278 = vmatpush.msrb.mxu2 %v3760_v56 }
  0xb6   : > { %1195 = vmatpush.msrb.mxu1 %v1194_v9  ;;  %1320 = vmatpush.msrb.mxu3 %v3716_v2  ;;  %v1223_v9 = vsub.f32 %v3801_v29, %v4675_v54  ;;  %v3872_v54 = vsub.f32 %v409_v21, %v3841_v30  ;;  %v4684_v32 = vand.u32 4294901760, %v3850_v45  ;;  %v3883_v21 = vsub.f32 %v408_v50, %v3859_v18 }
  0xb7   : > { %1132 = vmatpush.msrb.mxu0 %v3771_v12  ;;  %1281 = vmatpush.msrb.mxu2 %v3775_v24  ;;  %v1235_v49 = vsub.f32 %v3833_v52, %v4682_v61 }
  0xb8   : > { %1201 = vmatpush.msrb.mxu1 %v1200_v19  ;;  %1322 = vmatpush.msrb.mxu3 %v3730_v33  ;;  %v3865_v19 = vand.u32 4294901760, %v407_v55  ;;  %v1224_v43 = vand.u32 4294901760, %v1223_v9  ;;  %v1230_v9 = vand.u32 4294901760, %v1229_v42  ;;  %v4687_v6 = vand.u32 4294901760, %v3872_v54 }
  0xb9   : > { %1134 = vmatpush.msrb.mxu0 %v3783_v51  ;;  %1284 = vmatpush.msrb.mxu2 %v3787_v28  ;;  %v1492_v61 = vsub.f32 %v3850_v45, %v4684_v32 }
  0xba   : > { %1207 = vmatpush.msrb.mxu1 %v1206_v26  ;;  %1324 = vmatpush.msrb.mxu3 %v3743_v35  ;;  %v405_v26 = vld [vmem:[%s3107_s7 + $0x1d0] sm:$0xff]  ;;  %v3891_v11 = vsub.f32 %v407_v55, %v3865_v19  ;;  %v3903_v55 = vsub.f32 %v406_v58, %v3877_v0  ;;  %v1236_v58 = vand.u32 4294901760, %v1235_v49  ;;  %v1498_v36 = vsub.f32 %v3872_v54, %v4687_v6 }
  0xbb   : > { %1136 = vmatpush.msrb.mxu0 %v3806_v5  ;;  %1287 = vmatpush.msrb.mxu2 %v3801_v29  ;;  %v3896_v50 = vand.u32 4294901760, %v405_v26  ;;  %v1493_v49 = vand.u32 4294901760, %v1492_v61  ;;  %v3941_v6 = vand.u32 4294901760, %v402_v59  ;;  %v4749_v61 = vand.u32 4294901760, %v3676_v4 }
  0xbc   : > { %1213 = vmatpush.msrb.mxu1 %v1212_v62  ;;  %1326 = vmatpush.msrb.mxu3 %v3756_v53  ;;  %v404_v62 = vld [vmem:[%s3107_s7 + $0x1c8] sm:$0xff]  ;;  %v4689_v32 = vand.u32 4294901760, %v3891_v11  ;;  %v4750_v4 = vand.u32 4294901760, %v3681_v1 }
  0xbd   : > { %1138 = vmatpush.msrb.mxu0 %v3827_v40  ;;  %1290 = vmatpush.msrb.mxu2 %v3815_v20  ;;  %v3912_v42 = vand.u32 4294901760, %v404_v62 }
  0xbe   : > { %1219 = vmatpush.msrb.mxu1 %v1218_v41  ;;  %1328 = vmatpush.msrb.mxu3 %v3771_v12  ;;  %v1241_v41 = vsub.f32 %v3857_v37, %v4686_v39  ;;  %v4690_v39 = vand.u32 4294901760, %v3903_v55  ;;  %v1510_v16 = vsub.f32 %v3891_v11, %v4689_v32 }
  0xbf   : > { %1144 = vmatmul.f32.vlgmr.msrb.gmra.mxu0 %v1143_v63  ;;  %1293 = vmatpush.msrb.mxu2 %v3833_v52  ;;  %v4688_v63 = vand.u32 4294901760, %v3883_v21 }
  0xc0   : > { %1345 = vmatpush.msra.mxu0 %v1150_v31  ;;  %1225 = vmatpush.msrb.mxu1 %v1224_v43  ;;  %v3924_v31 = vsub.f32 %v405_v26, %v3896_v50  ;;  %v3926_v43 = vand.u32 4294901760, %v403_v17 }
  0xc1   : > { %1330 = vmatpush.msrb.mxu3 %v3783_v51  ;;  %1296 = vmatpush.msrb.mxu2 %v3857_v37  ;;  %v1504_v26 = vsub.f32 %v3883_v21, %v4688_v63 }
  0xc2   : > { %1349 = vmatpush.msra.mxu0 %v1156_v22  ;;  %1231 = vmatpush.msrb.mxu1 %v1230_v9  ;;  %v1242_v22 = vand.u32 4294901760, %v1241_v41  ;;  %v3939_v9 = vsub.f32 %v404_v62, %v3912_v42  ;;  %v1499_v41 = vand.u32 4294901760, %v1498_v36  ;;  %v3954_v63 = vsub.f32 %v403_v17, %v3926_v43  ;;  %v398_v62 = vld [vmem:[%s3107_s7 + $0x198] sm:$0xff] }
  0xc3   : > { %1332 = vmatpush.msrb.mxu3 %v3806_v5  ;;  %1299 = vmatmul.f32.vlgmr.msrb.gmra.mxu2 %v3793_v14  ;;  %v1516_v14 = vsub.f32 %v3903_v55, %v4690_v39  ;;  %v1505_v36 = vand.u32 4294901760, %v1504_v26  ;;  %v3967_v17 = vsub.f32 %v402_v59, %v3941_v6  ;;  %v4751_v1 = vand.u32 4294901760, %v3924_v31 }
  0xc4   : > { %1353 = vmatpush.msra.mxu0 %v1162_v27  ;;  %1449 = vmatpush.msra.mxu2 %v3820_v10  ;;  %v400_v27 = vld [vmem:[%s3107_s7 + $0x1a8] sm:$0xff]  ;;  %v4692_v26 = vand.u32 4294901760, %v3954_v63  ;;  %v4752_v39 = vand.u32 4294901760, %v3696_v38  ;;  %v397_v38 = vld [vmem:[%s3107_s7 + $0x190] sm:$0xff] }
  0xc5   : > { %1237 = vmatpush.msrb.mxu1 %v1236_v58  ;;  %1334 = vmatpush.msrb.mxu3 %v3827_v40  ;;  %v3956_v58 = vand.u32 4294901760, %v401_v60  ;;  %v3969_v32 = vand.u32 4294901760, %v400_v27 }
  0xc6   : > { %1338 = vmatmul.f32.vlgmr.msrb.gmra.mxu3 %v1141_v46  ;;  %1357 = vmatpush.msra.mxu0 %v4749_v61  ;;  %v399_v46 = vld [vmem:[%s3107_s7 + $0x1a0] sm:$0xff]  ;;  %v4691_v61 = vand.u32 4294901760, %v3939_v9 }
  0xc7   : > { %1451 = vmatpush.msra.mxu2 %v3841_v30  ;;  %1494 = vmatpush.msra.mxu3 %v1493_v49  ;;  %v1511_v49 = vand.u32 4294901760, %v1510_v16  ;;  %v3980_v59 = vsub.f32 %v401_v60, %v3956_v58  ;;  %v1517_v16 = vand.u32 4294901760, %v1516_v14  ;;  %v3993_v60 = vsub.f32 %v400_v27, %v3969_v32  ;;  %v395_v27 = vld [vmem:[%s3107_s7 + $0x180] sm:$0xff] }
  0xc8   : > { %1243 = vmatpush.msrb.mxu1 %v1242_v22  ;;  %1361 = vmatpush.msra.mxu0 %v4750_v4  ;;  %v1522_v22 = vsub.f32 %v3924_v31, %v4751_v1  ;;  %v3982_v4 = vand.u32 4294901760, %v399_v46  ;;  %v3995_v1 = vand.u32 4294901760, %v398_v62  ;;  %v1534_v14 = vsub.f32 %v3954_v63, %v4692_v26 }
  0xc9   : > { %1245 = vmatmul.f32.vlgmr.msrb.gmra.mxu1 %v3765_v57  ;;  %1453 = vmatpush.msra.mxu2 %v3859_v18 }
  0xca   : > { %1412 = vmatpush.msra.mxu1 %v3622_v13  ;;  %1500 = vmatpush.msra.mxu3 %v1499_v41  ;;  %v1528_v13 = vsub.f32 %v3939_v9, %v4691_v61  ;;  %v396_v61 = vld [vmem:[%s3107_s7 + $0x188] sm:$0xff]  ;;  %v420_v41 = vld.sshfl [vmem:[#allocation1 + $0x18] sm:$0xff pattern:$0x73625140]  ;;  %v4021_v26 = vsub.f32 %v398_v62, %v3995_v1  ;;  %s2881_s7 = scalar_lea.hbm %s4646_s6, 4 }
  0xcb   : > { %1365 = vmatpush.msra.mxu0 %v4752_v39  ;;  %1455 = vmatpush.msra.mxu2 %v3865_v19  ;;  %v4753_v39 = vand.u32 4294901760, %v3719_v25  ;;  %v4754_v25 = vand.u32 4294901760, %v3733_v8  ;;  %v4756_v8 = vand.u32 4294901760, %v3747_v44  ;;  %p2883_p11 = scmp.lt.s32.totalorder %s2881_s7, %s2877_s2 }
  0xcc   : > { %1414 = vmatpush.msra.mxu1 %v3630_v7  ;;  %1506 = vmatpush.msra.mxu3 %v1505_v36  ;;  %v1523_v7 = vand.u32 4294901760, %v1522_v22  ;;  %v4007_v36 = vsub.f32 %v399_v46, %v3982_v4  ;;  %v4755_v22 = vand.u32 4294901760, %v3967_v17  ;;  %v4758_v46 = vand.u32 4294901760, %v3760_v56 }
  0xcd   : > { %1369 = vmatpush.msra.mxu0 %v4753_v39  ;;  %1457 = vmatpush.msra.mxu2 %v3877_v0  ;;  %v4760_v56 = vand.u32 4294901760, %v3775_v24  ;;  %p2884_p12 = por %p2883_p11, %p2882_p10 }
  0xce   : > { %1416 = vmatpush.msra.mxu1 %v3638_v23  ;;  %1512 = vmatpush.msra.mxu3 %v1511_v49  ;;  %v4013_v23 = vand.u32 4294901760, %v397_v38  ;;  %v1529_v49 = vand.u32 4294901760, %v1528_v13  ;;  %v1540_v39 = vsub.f32 %v3967_v17, %v4755_v22  ;;  %v4757_v13 = vand.u32 4294901760, %v3980_v59 }
  0xcf   : > { %1373 = vmatpush.msra.mxu0 %v4754_v25  ;;  %1459 = vmatpush.msra.mxu2 %v3896_v50  ;;  %v4027_v25 = vand.u32 4294901760, %v396_v61  ;;  %v1557_v62 = vand.u32 4294901760, %v4007_v36  ;;  %p2885_p13 = pnand %p2884_p12, %p2880_p9 }
  0xd0   : > { %1418 = vmatpush.msra.mxu1 %v3649_v15  ;;  %1518 = vmatpush.msra.mxu3 %v1517_v16  ;;  %v4029_v15 = vand.u32 4294901760, %v420_v41  ;;  %v1535_v16 = vand.u32 4294901760, %v1534_v14  ;;  %v1546_v22 = vsub.f32 %v3980_v59, %v4757_v13  ;;  %v4040_v44 = vsub.f32 %v397_v38, %v4013_v23 }
  0xd1   : > { %1377 = vmatpush.msra.mxu0 %v4756_v8  ;;  %1461 = vmatpush.msra.mxu2 %v3912_v42  ;;  %v4042_v8 = vand.u32 4294901760, %v395_v27  ;;  %v1563_v13 = vand.u32 4294901760, %v4021_v26  ;;  %v4053_v38 = vsub.f32 %v396_v61, %v4027_v25 }
  0xd2   : > { %1420 = vmatpush.msra.mxu1 %v3657_v48  ;;  %1524 = vmatpush.msra.mxu3 %v1523_v7  ;;  %v1541_v48 = vand.u32 4294901760, %v1540_v39  ;;  %v4759_v7 = vand.u32 4294901760, %v3993_v60  ;;  %v4761_v39 = vand.u32 4294901760, %v3787_v28  ;;  %v1569_v24 = vand.u32 4294901760, %v4040_v44 }
  0xd3   : > { %1381 = vmatpush.msra.mxu0 %v4758_v46  ;;  %1463 = vmatpush.msra.mxu2 %v3926_v43  ;;  %v4056_v46 = vsub.f32 %v420_v41, %v4029_v15  ;;  %v4067_v61 = vsub.f32 %v395_v27, %v4042_v8  ;;  %v1564_v41 = vsub.f32 %v4021_v26, %v1563_v13  ;;  %v1575_v28 = vand.u32 4294901760, %v4053_v38 }
  0xd4   : > { %1422 = vmatpush.msra.mxu1 %v3668_v47  ;;  %1530 = vmatpush.msra.mxu3 %v1529_v49  ;;  %v1552_v14 = vsub.f32 %v3993_v60, %v4759_v7  ;;  %v1547_v47 = vand.u32 4294901760, %v1546_v22  ;;  %v1558_v49 = vsub.f32 %v4007_v36, %v1557_v62 }
  0xd5   : > { %1385 = vmatpush.msra.mxu0 %v4760_v56  ;;  %1465 = vmatpush.msra.mxu2 %v3941_v6  ;;  %v1482_v22 = vand.u32 4294901760, %v4056_v46  ;;  %v1565_v7 = vand.u32 4294901760, %v1564_v41 }
  0xd6   : > { %1424 = vmatpush.msra.mxu1 %v3690_v34  ;;  %1536 = vmatpush.msra.mxu3 %v1535_v16  ;;  %v1553_v34 = vand.u32 4294901760, %v1552_v14  ;;  %v4762_v16 = vand.u32 4294901760, %v3801_v29  ;;  %v1559_v27 = vand.u32 4294901760, %v1558_v49  ;;  %v1570_v29 = vsub.f32 %v4040_v44, %v1569_v24 }
  0xd7   : > { %1389 = vmatpush.msra.mxu0 %v4761_v39  ;;  %1467 = vmatpush.msra.mxu2 %v3956_v58  ;;  %v4764_v14 = vand.u32 4294901760, %v3833_v52  ;;  %v2764_v39 = vld [vmem:[%s4643_s3] ss:$0 sm:$0xff] }
  0xd8   : > { %1426 = vmatpush.msra.mxu1 %v3704_v3  ;;  %1542 = vmatpush.msra.mxu3 %v1541_v48  ;;  %v4763_v3 = vand.u32 4294901760, %v3815_v20  ;;  %v1581_v48 = vand.u32 4294901760, %v4067_v61  ;;  %v1483_v20 = vsub.f32 %v4056_v46, %v1482_v22  ;;  %v1571_v52 = vand.u32 4294901760, %v1570_v29 }
  0xd9   : > { %1393 = vmatpush.msra.mxu0 %v4762_v16  ;;  %1469 = vmatpush.msra.mxu2 %v3969_v32 }
  0xda   : > { %1428 = vmatpush.msra.mxu1 %v3716_v2  ;;  %1548 = vmatpush.msra.mxu3 %v1547_v47  ;;  %v1576_v2 = vsub.f32 %v4053_v38, %v1575_v28  ;;  %v1582_v56 = vsub.f32 %v4067_v61, %v1581_v48 }
  0xdb   : > { %1397 = vmatpush.msra.mxu0 %v4763_v3  ;;  %1471 = vmatpush.msra.mxu2 %v3982_v4  ;;  %v1797_v3 = vld [vmem:[#allocation7 + $0x38] sm:$0xff] }
  0xdc   : > { %1430 = vmatpush.msra.mxu1 %v3730_v33  ;;  %1554 = vmatpush.msra.mxu3 %v1553_v34  ;;  %v4765_v33 = vand.u32 4294901760, %v3857_v37  ;;  %v1577_v47 = vand.u32 4294901760, %v1576_v2  ;;  %v1583_v37 = vand.u32 4294901760, %v1582_v56 }
  0xdd   : > { %1401 = vmatpush.msra.mxu0 %v4764_v14  ;;  %1473 = vmatpush.msra.mxu2 %v3995_v1  ;;  %v4305_v14 = vand.u32 4294901760, %v1797_v3 }
  0xde   : > { %1432 = vmatpush.msra.mxu1 %v3743_v35  ;;  %1560 = vmatpush.msra.mxu3 %v1559_v27  ;;  %v1484_v35 = vand.u32 4294901760, %v1483_v20 }
  0xdf   : > { %1405 = vmatpush.msra.mxu0 %v4765_v33  ;;  %1475 = vmatpush.msra.mxu2 %v4013_v23  ;;  %v1796_v33 = vld [vmem:[#allocation7 + $0x30] sm:$0xff] }
  0xe0   : > { %1434 = vmatpush.msra.mxu1 %v3756_v53  ;;  %1566 = vmatpush.msra.mxu3 %v1565_v7  ;;  %v4766_v53 = vand.u32 4294901760, %v3850_v45 }
  0xe1   : > { %1407 = vmatmul.f32.vlgmr.msra.gmra.mxu0 %v3765_v57  ;;  %1477 = vmatpush.msra.mxu2 %v4027_v25 }
  0xe2   : > { %1592 = vmatpush.msrb.mxu0 %v3850_v45  ;;  %1436 = vmatpush.msra.mxu1 %v3771_v12  ;;  %v4767_v12 = vand.u32 4294901760, %v3872_v54 }
  0xe3   : > { %1572 = vmatpush.msra.mxu3 %v1571_v52  ;;  %1479 = vmatpush.msra.mxu2 %v4042_v8 }
  0xe4   : > { %1595 = vmatpush.msrb.mxu0 %v3872_v54  ;;  %1438 = vmatpush.msra.mxu1 %v3783_v51  ;;  %v4768_v51 = vand.u32 4294901760, %v3883_v21  ;;  %v4776_v54 = vand.u32 4294901760, %v3993_v60 }
  0xe5   : > { %1578 = vmatpush.msra.mxu3 %v1577_v47  ;;  %1485 = vmatmul.f32.vlgmr.msra.gmra.mxu2 %v1484_v35  ;;  %v4319_v47 = vsub.f32 %v1797_v3, %v4305_v14  ;;  %v4321_v35 = vand.u32 4294901760, %v1796_v33  ;;  %v1791_v3 = vld [vmem:[#allocation7 + $0x8] sm:$0xff] }
  0xe6   : > { %1598 = vmatpush.msrb.mxu0 %v3883_v21  ;;  %1686 = vmatpush.msrb.mxu2 %v4766_v53 }
  0xe7   : > { %1440 = vmatpush.msra.mxu1 %v3806_v5  ;;  %1584 = vmatpush.msra.mxu3 %v1583_v37  ;;  %v4769_v5 = vand.u32 4294901760, %v3891_v11  ;;  %4777 = vst [vmem:[#allocation18_spill] sm:$0xff] %v4319_v47 }
  0xe8   : > { %1586 = vmatmul.f32.vlgmr.msra.gmra.mxu3 %v4029_v15  ;;  %1601 = vmatpush.msrb.mxu0 %v3891_v11  ;;  %v4772_v11 = vand.u32 4294901760, %v3939_v9 }
  0xe9   : > { %1690 = vmatpush.msrb.mxu2 %v4767_v12  ;;  %1753 = vmatpush.msrb.mxu3 %v3820_v10  ;;  %v1795_v12 = vld [vmem:[#allocation7 + $0x28] sm:$0xff] }
  0xea   : > { %1442 = vmatpush.msra.mxu1 %v3827_v40  ;;  %1604 = vmatpush.msrb.mxu0 %v3903_v55  ;;  %v4774_v40 = vand.u32 4294901760, %v3967_v17 }
  0xeb   : > { %1444 = vmatmul.f32.vlgmr.msra.gmra.mxu1 %v3765_v57  ;;  %1694 = vmatpush.msrb.mxu2 %v4768_v51  ;;  %v4770_v57 = vand.u32 4294901760, %v3903_v55 }
  0xec   : > { %1645 = vmatpush.msrb.mxu1 %v3820_v10  ;;  %1755 = vmatpush.msrb.mxu3 %v3841_v30  ;;  %v4771_v10 = vand.u32 4294901760, %v3924_v31 }
  0xed   : > { %1607 = vmatpush.msrb.mxu0 %v3924_v31  ;;  %1698 = vmatpush.msrb.mxu2 %v4769_v5 }
  0xee   : > { %1647 = vmatpush.msrb.mxu1 %v3841_v30  ;;  %1757 = vmatpush.msrb.mxu3 %v3859_v18 }
  0xef   : > { %1610 = vmatpush.msrb.mxu0 %v3939_v9  ;;  %1702 = vmatpush.msrb.mxu2 %v4770_v57  ;;  %v1803_v9 = vld [vmem:[#allocation7 + $0x68] sm:$0xff]  ;;  %v4333_v57 = vand.u32 4294901760, %v4319_v47 }
  0xf0   : > { %1649 = vmatpush.msrb.mxu1 %v3859_v18  ;;  %1759 = vmatpush.msrb.mxu3 %v3865_v19  ;;  %v4773_v18 = vand.u32 4294901760, %v3954_v63 }
  0xf1   : > { %1613 = vmatpush.msrb.mxu0 %v3954_v63  ;;  %1706 = vmatpush.msrb.mxu2 %v4771_v10  ;;  %v4338_v10 = vsub.f32 %v1796_v33, %v4321_v35 }
  0xf2   : > { %1651 = vmatpush.msrb.mxu1 %v3865_v19  ;;  %1761 = vmatpush.msrb.mxu3 %v3877_v0 }
  0xf3   : > { %1616 = vmatpush.msrb.mxu0 %v3967_v17  ;;  %1710 = vmatpush.msrb.mxu2 %v4772_v11  ;;  %v1802_v17 = vld [vmem:[#allocation7 + $0x60] sm:$0xff]  ;;  %v463_v34 = vpop.f32.mrf.mxu0  ;;  %4778 = vst [vmem:[#allocation19_spill] sm:$0xff] %v4338_v10  ;;  %v4340_v11 = vand.u32 4294901760, %v1795_v12 }
  0xf4   : > { %1653 = vmatpush.msrb.mxu1 %v3877_v0  ;;  %1763 = vmatpush.msrb.mxu3 %v3896_v50  ;;  %v4775_v0 = vand.u32 4294901760, %v3980_v59  ;;  %v464_v2 = vadd.f32 %v2764_v39, %v463_v34 }
  0xf5   : > { %1619 = vmatpush.msrb.mxu0 %v3980_v59  ;;  %1714 = vmatpush.msrb.mxu2 %v4773_v18  ;;  %v4235_v59 = vand.u32 4294901760, %v1802_v17  ;;  %v1794_v18 = vld [vmem:[#allocation7 + $0x20] sm:$0xff] }
  0xf6   : > { %1655 = vmatpush.msrb.mxu1 %v3896_v50  ;;  %1765 = vmatpush.msrb.mxu3 %v3912_v42 }
  0xf7   : > { %1622 = vmatpush.msrb.mxu0 %v3993_v60  ;;  %1718 = vmatpush.msrb.mxu2 %v4774_v40 }
  0xf8   : > { %1657 = vmatpush.msrb.mxu1 %v3912_v42  ;;  %1767 = vmatpush.msrb.mxu3 %v3926_v43 }
  0xf9   : > { %1625 = vmatpush.msrb.mxu0 %v4007_v36  ;;  %1722 = vmatpush.msrb.mxu2 %v4775_v0 }
  0xfa   : > { %1659 = vmatpush.msrb.mxu1 %v3926_v43  ;;  %1769 = vmatpush.msrb.mxu3 %v3941_v6 }
  0xfb   : > { %1628 = vmatpush.msrb.mxu0 %v4021_v26  ;;  %1726 = vmatpush.msrb.mxu2 %v4776_v54  ;;  %v1898_v54 = vsub.f32 %v4319_v47, %v4333_v57 }
  0xfc   : > { %1661 = vmatpush.msrb.mxu1 %v3941_v6  ;;  %1771 = vmatpush.msrb.mxu3 %v3956_v58  ;;  %v1805_v6 = vld [vmem:[#allocation7 + $0x78] sm:$0xff] }
  0xfd   : > { %1631 = vmatpush.msrb.mxu0 %v4040_v44  ;;  %1730 = vmatpush.msrb.mxu2 %v1557_v62  ;;  %v4198_v30 = vand.u32 4294901760, %v1805_v6 }
  0xfe   : > { %1663 = vmatpush.msrb.mxu1 %v3956_v58  ;;  %1773 = vmatpush.msrb.mxu3 %v3969_v32  ;;  %v4229_v58 = vand.u32 4294901760, %v1803_v9 }
  0xff   : > { %1634 = vmatpush.msrb.mxu0 %v4053_v38  ;;  %1734 = vmatpush.msrb.mxu2 %v1563_v13  ;;  %v4203_v19 = vsub.f32 %v1805_v6, %v4198_v30  ;;  %v4347_v6 = vand.u32 4294901760, %v1794_v18 }
 0x100   : > { %1665 = vmatpush.msrb.mxu1 %v3969_v32  ;;  %1775 = vmatpush.msrb.mxu3 %v3982_v4  ;;  %v1804_v32 = vld [vmem:[#allocation7 + $0x70] sm:$0xff]  ;;  %v4233_v26 = vsub.f32 %v1803_v9, %v4229_v58  ;;  %v564_v37 = vpop.f32.mrf.mxu1  ;;  %v1793_v9 = vld [vmem:[#allocation7 + $0x18] sm:$0xff] }
 0x101   : > { %1637 = vmatpush.msrb.mxu0 %v4067_v61  ;;  %1738 = vmatpush.msrb.mxu2 %v1569_v24  ;;  %v4200_v45 = vand.u32 4294901760, %v1804_v32  ;;  %v4211_v50 = vand.u32 4294901760, %v4203_v19  ;;  %v1798_v61 = vld [vmem:[#allocation7 + $0x40] sm:$0xff]  ;;  %v565_v40 = vadd.f32 %v564_v37, %v464_v2  ;;  %v4390_v37 = vand.u32 4294901760, %v1791_v3 }
 0x102   : > { %1667 = vmatpush.msrb.mxu1 %v3982_v4  ;;  %1777 = vmatpush.msrb.mxu3 %v3995_v1  ;;  %v1801_v4 = vld [vmem:[#allocation7 + $0x58] sm:$0xff]  ;;  %v4240_v60 = vand.u32 4294901760, %v4233_v26  ;;  %v1790_v2 = vld [vmem:[#allocation7] sm:$0xff] }
 0x103   : > { %1640 = vmatmul.f32.vlgmr.msrb.gmra.mxu0 %v4056_v46  ;;  %1742 = vmatpush.msrb.mxu2 %v1575_v28  ;;  %v4206_v21 = vsub.f32 %v1804_v32, %v4200_v45  ;;  %v1850_v63 = vsub.f32 %v4203_v19, %v4211_v50  ;;  %v4245_v36 = vand.u32 4294901760, %v1801_v4  ;;  %v618_v32 = vpop.f32.mrf.mxu2 }
 0x104   : > { %1669 = vmatpush.msrb.mxu1 %v3995_v1  ;;  %1779 = vmatpush.msrb.mxu3 %v4013_v23  ;;  %v4243_v1 = vsub.f32 %v1802_v17, %v4235_v59  ;;  %v4359_v17 = vand.u32 4294901760, %v1898_v54  ;;  %v619_v39 = vadd.f32 %v618_v32, %v565_v40  ;;  %v4409_v32 = vsub.f32 %v1791_v3, %v4390_v37 }
 0x105   : > { %1746 = vmatpush.msrb.mxu2 %v1581_v48  ;;  %1807 = vmatpush.msra.mxu0 %v4198_v30  ;;  %v4214_v55 = vand.u32 4294901760, %v4206_v21  ;;  %v4224_v31 = vand.u32 4294901760, %v1850_v63  ;;  %v4256_v62 = vsub.f32 %v1801_v4, %v4245_v36  ;;  %v4353_v63 = vand.u32 4294901760, %v4338_v10 }
 0x106   : > { %1671 = vmatpush.msrb.mxu1 %v4013_v23  ;;  %1781 = vmatpush.msrb.mxu3 %v4027_v25  ;;  %v1800_v23 = vld [vmem:[#allocation7 + $0x50] sm:$0xff]  ;;  %v4362_v4 = vsub.f32 %v1794_v18, %v4347_v6  ;;  %v726_v3 = vpop.f32.mrf.mxu0 }
 0x107   : > { %1748 = vmatmul.f32.vlgmr.msrb.gmra.mxu2 %v4029_v15  ;;  %1809 = vmatpush.msra.mxu0 %v4200_v45  ;;  %v1856_v42 = vsub.f32 %v4206_v21, %v4214_v55  ;;  %v4260_v44 = vand.u32 4294901760, %v1800_v23  ;;  %v4268_v46 = vand.u32 4294901760, %v4256_v62 }
 0x108   : > { %1673 = vmatpush.msrb.mxu1 %v4027_v25  ;;  %1783 = vmatpush.msrb.mxu3 %v4042_v8  ;;  %v1862_v25 = vsub.f32 %v4233_v26, %v4240_v60  ;;  %4780 = vst [vmem:[#allocation21_spill] sm:$0xff] %v4362_v4 }
 0x109   : > { %1785 = vmatmul.f32.vlgmr.msrb.gmra.mxu3 %v4029_v15  ;;  %1950 = vmatpush.msra.mxu2 %v4203_v19  ;;  %v4226_v43 = vand.u32 4294901760, %v1856_v42  ;;  %v4253_v15 = vand.u32 4294901760, %v4243_v1  ;;  %v4277_v24 = vsub.f32 %v1800_v23, %v4260_v44  ;;  %v1874_v16 = vsub.f32 %v4256_v62, %v4268_v46 }
 0x10a   : > { %1675 = vmatpush.msrb.mxu1 %v4042_v8  ;;  %2003 = vmatpush.msra.mxu3 %v4198_v30  ;;  %v1799_v8 = vld [vmem:[#allocation7 + $0x48] sm:$0xff]  ;;  %v4263_v13 = vand.u32 4294901760, %v1862_v25  ;;  %v4356_v42 = vsub.f32 %v1795_v12, %v4340_v11  ;;  %v4364_v23 = vand.u32 4294901760, %v1793_v9  ;;  %v1904_v25 = vsub.f32 %v4338_v10, %v4353_v63 }
 0x10b   : > { %1679 = vmatmul.f32.vlgmr.msrb.gmra.mxu1 %v1482_v22  ;;  %1953 = vmatpush.msra.mxu2 %v4206_v21  ;;  %v1868_v38 = vsub.f32 %v4243_v1, %v4253_v15  ;;  %v4270_v49 = vand.u32 4294901760, %v1799_v8  ;;  %v4289_v22 = vand.u32 4294901760, %v1798_v61  ;;  %v4292_v27 = vand.u32 4294901760, %v4277_v24 }
 0x10c   : > { %2005 = vmatpush.msra.mxu3 %v4200_v45  ;;  %1852 = vmatpush.msra.mxu1 %v4224_v31  ;;  %v4297_v29 = vand.u32 4294901760, %v1874_v16  ;;  %4779 = vst [vmem:[#allocation20_spill] sm:$0xff] %v4356_v42  ;;  %v4379_v34 = vsub.f32 %v1793_v9, %v4364_v23  ;;  %v4386_v33 = vand.u32 4294901760, %v1904_v25  ;;  %v4392_v12 = vand.u32 4294901760, %v1790_v2 }
 0x10d   : > { %1811 = vmatpush.msra.mxu0 %v4229_v58  ;;  %1956 = vmatpush.msra.mxu2 %v4233_v26  ;;  %v4282_v41 = vand.u32 4294901760, %v1868_v38  ;;  %v4287_v28 = vsub.f32 %v1799_v8, %v4270_v49  ;;  %v4303_v7 = vsub.f32 %v1798_v61, %v4289_v22  ;;  %v1880_v20 = vsub.f32 %v4277_v24, %v4292_v27  ;;  %v1792_v38 = vld [vmem:[#allocation7 + $0x10] sm:$0xff] }
 0x10e   : > { %1858 = vmatpush.msra.mxu1 %v4226_v43  ;;  %2007 = vmatpush.msra.mxu3 %v4229_v58  ;;  %v4372_v8 = vand.u32 4294901760, %v4356_v42  ;;  %v4376_v61 = vand.u32 4294901760, %v4362_v4  ;;  %4781 = vst [vmem:[#allocation22_spill] sm:$0xff] %v4379_v34  ;;  %v4381_v16 = vand.u32 4294901760, %v1792_v38  ;;  %v4398_v18 = vand.u32 4294901760, %v4379_v34 }
 0x10f   : > { %1813 = vmatpush.msra.mxu0 %v4235_v59  ;;  %1959 = vmatpush.msra.mxu2 %v4243_v1  ;;  %v4300_v48 = vand.u32 4294901760, %v4287_v28  ;;  %v4316_v56 = vand.u32 4294901760, %v4303_v7  ;;  %v4324_v53 = vand.u32 4294901760, %v1880_v20  ;;  %v657_v20 = vpop.f32.mrf.mxu3  ;;  %v4412_v9 = vsub.f32 %v1790_v2, %v4392_v12 }
 0x110   : > { %2009 = vmatpush.msra.mxu3 %v4235_v59  ;;  %1864 = vmatpush.msra.mxu1 %v4263_v13  ;;  %v4401_v40 = vsub.f32 %v1792_v38, %v4381_v16  ;;  %v658_v25 = vadd.f32 %v657_v20, %v619_v39  ;;  %v1922_v38 = vsub.f32 %v4379_v34, %v4398_v18  ;;  %v4426_v2 = vand.u32 4294901760, %v4409_v32 }
 0x111   : > { %1815 = vmatpush.msra.mxu0 %v4245_v36  ;;  %1962 = vmatpush.msra.mxu2 %v4256_v62  ;;  %v1886_v52 = vsub.f32 %v4287_v28, %v4300_v48  ;;  %v1892_v5 = vsub.f32 %v4303_v7, %v4316_v56  ;;  %v4429_v39 = vand.u32 4294901760, %v4412_v9 }
 0x112   : > { %2011 = vmatpush.msra.mxu3 %v4245_v36  ;;  %1870 = vmatpush.msra.mxu1 %v4282_v41  ;;  %4782 = vst [vmem:[#allocation23_spill] sm:$0xff] %v4401_v40  ;;  %v4432_v20 = vand.u32 4294901760, %v1922_v38 }
 0x113   : > { %1817 = vmatpush.msra.mxu0 %v4260_v44  ;;  %1965 = vmatpush.msra.mxu2 %v4277_v24  ;;  %v4328_v51 = vand.u32 4294901760, %v1886_v52  ;;  %v4343_v0 = vand.u32 4294901760, %v1892_v5  ;;  %v1910_v52 = vsub.f32 %v4356_v42, %v4372_v8  ;;  %v1916_v5 = vsub.f32 %v4362_v4, %v4376_v61 }
 0x114   : > { %2013 = vmatpush.msra.mxu3 %v4260_v44  ;;  %1876 = vmatpush.msra.mxu1 %v4297_v29 }
 0x115   : > { %1819 = vmatpush.msra.mxu0 %v4270_v49  ;;  %1968 = vmatpush.msra.mxu2 %v4287_v28  ;;  %v4406_v54 = vand.u32 4294901760, %v1910_v52 }
 0x116   : > { %2015 = vmatpush.msra.mxu3 %v4270_v49  ;;  %1882 = vmatpush.msra.mxu1 %v4324_v53 }
 0x117   : > { %1821 = vmatpush.msra.mxu0 %v4289_v22  ;;  %1971 = vmatpush.msra.mxu2 %v4303_v7 }
 0x118   : > { %2017 = vmatpush.msra.mxu3 %v4289_v22  ;;  %1888 = vmatpush.msra.mxu1 %v4328_v51 }
 0x119   : > { %1823 = vmatpush.msra.mxu0 %v4305_v14  ;;  %1974 = vmatpush.msra.mxu2 %v4319_v47 }
 0x11a   : > { %2019 = vmatpush.msra.mxu3 %v4305_v14  ;;  %1894 = vmatpush.msra.mxu1 %v4343_v0 }
 0x11b   : > { %1825 = vmatpush.msra.mxu0 %v4321_v35  ;;  %1977 = vmatpush.msra.mxu2 %v4338_v10  ;;  %v727_v10 = vadd.f32 %v726_v3, %v658_v25 }
 0x11c   : > { %2021 = vmatpush.msra.mxu3 %v4321_v35  ;;  %1900 = vmatpush.msra.mxu1 %v4359_v17 }
 0x11d   : > { %1827 = vmatpush.msra.mxu0 %v4340_v11  ;;  %1980 = vmatpush.msra.mxu2 %v4356_v42  ;;  %v4415_v42 = vand.u32 4294901760, %v1916_v5  ;;  %v1934_v5 = vsub.f32 %v4409_v32, %v4426_v2 }
 0x11e   : > { %2023 = vmatpush.msra.mxu3 %v4340_v11  ;;  %1906 = vmatpush.msra.mxu1 %v4386_v33 }
 0x11f   : > { %1829 = vmatpush.msra.mxu0 %v4347_v6  ;;  %1983 = vmatpush.msra.mxu2 %v4362_v4  ;;  %v4420_v4 = vand.u32 4294901760, %v4401_v40  ;;  %v4449_v47 = vand.u32 4294901760, %v1934_v5 }
 0x120   : > { %2025 = vmatpush.msra.mxu3 %v4347_v6  ;;  %1912 = vmatpush.msra.mxu1 %v4406_v54 }
 0x121   : > { %1831 = vmatpush.msra.mxu0 %v4364_v23  ;;  %1986 = vmatpush.msra.mxu2 %v4379_v34  ;;  %v1928_v52 = vsub.f32 %v4401_v40, %v4420_v4  ;;  %v1940_v34 = vsub.f32 %v4412_v9, %v4429_v39 }
 0x122   : > { %2027 = vmatpush.msra.mxu3 %v4364_v23  ;;  %1918 = vmatpush.msra.mxu1 %v4415_v42 }
 0x123   : > { %1833 = vmatpush.msra.mxu0 %v4381_v16  ;;  %1989 = vmatpush.msra.mxu2 %v4401_v40  ;;  %v4444_v38 = vand.u32 4294901760, %v1928_v52  ;;  %v763_v40 = vpop.f32.mrf.mxu1  ;;  %v4455_v25 = vand.u32 4294901760, %v1940_v34  ;;  %v804_v52 = vpop.f32.mrf.mxu2 }
 0x124   : > { %2029 = vmatpush.msra.mxu3 %v4381_v16  ;;  %1924 = vmatpush.msra.mxu1 %v4432_v20  ;;  %v764_v3 = vadd.f32 %v763_v40, %v727_v10 }
 0x125   : > { %1835 = vmatpush.msra.mxu0 %v4390_v37  ;;  %1992 = vmatpush.msra.mxu2 %v4409_v32 }
 0x126   : > { %2031 = vmatpush.msra.mxu3 %v4390_v37  ;;  %1930 = vmatpush.msra.mxu1 %v4444_v38  ;;  %v805_v34 = vadd.f32 %v804_v52, %v764_v3 }
 0x127   : > { %1837 = vmatpush.msra.mxu0 %v4392_v12  ;;  %1995 = vmatpush.msra.mxu2 %v4412_v9 }
 0x128   : > { %2033 = vmatpush.msra.mxu3 %v4392_v12  ;;  %1936 = vmatpush.msra.mxu1 %v4449_v47 }
 0x129   : > { %2044 = vmatpush.msrb.mxu0 %v4211_v50  ;;  %2151 = vmatpush.msrb.mxu2 %v4198_v30 }
 0x12a   : > { %2196 = vmatpush.msrb.mxu3 %v4224_v31  ;;  %1942 = vmatpush.msra.mxu1 %v4455_v25  ;;  %v905_v31 = vpop.f32.mrf.mxu3 }
 0x12b   : > { %2048 = vmatpush.msrb.mxu0 %v4214_v55  ;;  %2153 = vmatpush.msrb.mxu2 %v4200_v45  ;;  %v998_v10 = vpop.f32.mrf.mxu1  ;;  %v1067_v40 = vpop.f32.mrf.mxu2 }
 0x12c   : > { %2202 = vmatpush.msrb.mxu3 %v4226_v43  ;;  %2111 = vmatpush.msrb.mxu1 %v4198_v30  ;;  %v959_v43 = vpop.f32.mrf.mxu0 }
 0x12d   : > { %2052 = vmatpush.msrb.mxu0 %v4240_v60  ;;  %2155 = vmatpush.msrb.mxu2 %v4229_v58 }
 0x12e   : > { %2208 = vmatpush.msrb.mxu3 %v4263_v13  ;;  %2113 = vmatpush.msrb.mxu1 %v4200_v45  ;;  %v906_v13 = vadd.f32 %v905_v31, %v805_v34 }
 0x12f   : > { %2056 = vmatpush.msrb.mxu0 %v4253_v15  ;;  %2157 = vmatpush.msrb.mxu2 %v4235_v59 }
 0x130   : > { %2214 = vmatpush.msrb.mxu3 %v4282_v41  ;;  %2115 = vmatpush.msrb.mxu1 %v4229_v58  ;;  %v960_v41 = vadd.f32 %v959_v43, %v906_v13 }
 0x131   : > { %2060 = vmatpush.msrb.mxu0 %v4268_v46  ;;  %2159 = vmatpush.msrb.mxu2 %v4245_v36 }
 0x132   : > { %2220 = vmatpush.msrb.mxu3 %v4297_v29  ;;  %2117 = vmatpush.msrb.mxu1 %v4235_v59  ;;  %v999_v29 = vadd.f32 %v998_v10, %v960_v41 }
 0x133   : > { %2064 = vmatpush.msrb.mxu0 %v4292_v27  ;;  %2161 = vmatpush.msrb.mxu2 %v4260_v44 }
 0x134   : > { %2226 = vmatpush.msrb.mxu3 %v4324_v53  ;;  %2119 = vmatpush.msrb.mxu1 %v4245_v36  ;;  %v1068_v53 = vadd.f32 %v1067_v40, %v999_v29 }
 0x135   : > { %2068 = vmatpush.msrb.mxu0 %v4300_v48  ;;  %2163 = vmatpush.msrb.mxu2 %v4270_v49 }
 0x136   : > { %2232 = vmatpush.msrb.mxu3 %v4328_v51  ;;  %2121 = vmatpush.msrb.mxu1 %v4260_v44  ;;  %v1104_v51 = vpop.f32.mrf.mxu3 }
 0x137   : > { %2072 = vmatpush.msrb.mxu0 %v4316_v56  ;;  %2165 = vmatpush.msrb.mxu2 %v4289_v22 }
 0x138   : > { %2238 = vmatpush.msrb.mxu3 %v4343_v0  ;;  %2123 = vmatpush.msrb.mxu1 %v4270_v49 }
 0x139   : > { %2076 = vmatpush.msrb.mxu0 %v4333_v57  ;;  %2167 = vmatpush.msrb.mxu2 %v4305_v14 }
 0x13a   : > { %2244 = vmatpush.msrb.mxu3 %v4359_v17  ;;  %2125 = vmatpush.msrb.mxu1 %v4289_v22  ;;  %v1105_v17 = vadd.f32 %v1104_v51, %v1068_v53 }
 0x13b   : > { %2080 = vmatpush.msrb.mxu0 %v4353_v63  ;;  %2169 = vmatpush.msrb.mxu2 %v4321_v35 }
 0x13c   : > { %2250 = vmatpush.msrb.mxu3 %v4386_v33  ;;  %v1145_v0 = vpop.f32.mrf.mxu0  ;;  %2127 = vmatpush.msrb.mxu1 %v4305_v14 }
 0x13d   : > { %2084 = vmatpush.msrb.mxu0 %v4372_v8  ;;  %2171 = vmatpush.msrb.mxu2 %v4340_v11  ;;  %v1146_v33 = vadd.f32 %v1145_v0, %v1105_v17 }
 0x13e   : > { %2256 = vmatpush.msrb.mxu3 %v4406_v54  ;;  %2129 = vmatpush.msrb.mxu1 %v4321_v35 }
 0x13f   : > { %2088 = vmatpush.msrb.mxu0 %v4376_v61  ;;  %2173 = vmatpush.msrb.mxu2 %v4347_v6 }
 0x140   : > { %2262 = vmatpush.msrb.mxu3 %v4415_v42  ;;  %2131 = vmatpush.msrb.mxu1 %v4340_v11 }
 0x141   : > { %2092 = vmatpush.msrb.mxu0 %v4398_v18  ;;  %2175 = vmatpush.msrb.mxu2 %v4364_v23 }
 0x142   : > { %2268 = vmatpush.msrb.mxu3 %v4432_v20  ;;  %2133 = vmatpush.msrb.mxu1 %v4347_v6 }
 0x143   : > { %2096 = vmatpush.msrb.mxu0 %v4420_v4  ;;  %2177 = vmatpush.msrb.mxu2 %v4381_v16 }
 0x144   : > { %2274 = vmatpush.msrb.mxu3 %v4444_v38  ;;  %2135 = vmatpush.msrb.mxu1 %v4364_v23 }
 0x145   : > { %2100 = vmatpush.msrb.mxu0 %v4426_v2  ;;  %2179 = vmatpush.msrb.mxu2 %v4390_v37 }
 0x146   : > { %v1246_v5 = vpop.f32.mrf.mxu1  ;;  %v1300_v3 = vpop.f32.mrf.mxu2  ;;  %2280 = vmatpush.msrb.mxu3 %v4449_v47  ;;  %2137 = vmatpush.msrb.mxu1 %v4381_v16 }
 0x147   : > { %v1247_v54 = vadd.f32 %v1246_v5, %v1146_v33  ;;  %2104 = vmatpush.msrb.mxu0 %v4429_v39  ;;  %2181 = vmatpush.msrb.mxu2 %v4392_v12 }
 0x148   : > { %2286 = vmatpush.msrb.mxu3 %v4455_v25  ;;  %2139 = vmatpush.msrb.mxu1 %v4390_v37 }
 0x149   : > { %v1301_v42 = vadd.f32 %v1300_v3, %v1247_v54  ;;  %v1339_v20 = vpop.f32.mrf.mxu3 }
 0x14a   : > { %2141 = vmatpush.msrb.mxu1 %v4392_v12 }
 0x14b   : > { %v1340_v52 = vadd.f32 %v1339_v20, %v1301_v42 }
 0x15e   : > { %v1408_v38 = vpop.f32.mrf.mxu0 }
 0x15f   : > { %v1409_v47 = vadd.f32 %v1408_v38, %v1340_v52 }
 0x168   : > { %v1445_v34 = vpop.f32.mrf.mxu1  ;;  %v1486_v43 = vpop.f32.mrf.mxu2 }
 0x169   : > { %v1446_v31 = vadd.f32 %v1445_v34, %v1409_v47 }
 0x16b   : > { %v1487_v13 = vadd.f32 %v1486_v43, %v1446_v31  ;;  %v1587_v10 = vpop.f32.mrf.mxu3 }
 0x16d   : > { %v1588_v25 = vadd.f32 %v1587_v10, %v1487_v13 }
 0x180   : > { %v1641_v41 = vpop.f32.mrf.mxu0 }
 0x181   : > { %v1642_v29 = vadd.f32 %v1641_v41, %v1588_v25 }
 0x188   : > { %v1680_v40 = vpop.f32.mrf.mxu1 }
 0x189   : > { %v1681_v53 = vadd.f32 %v1680_v40, %v1642_v29 }
 0x18a   : > { %v1749_v51 = vpop.f32.mrf.mxu2 }
 0x18b   : > { %v1750_v0 = vadd.f32 %v1749_v51, %v1681_v53  ;;  %v2765_v51 = vld [vmem:[%s4644_s4] ss:$0 sm:$0xff] }
 0x18c   : > { %v1786_v17 = vpop.f32.mrf.mxu3 }
 0x18d   : > { %v1787_v5 = vadd.f32 %v1786_v17, %v1750_v0 }
 0x18f   : > { %v4521_v33 = vmax.f32 %v1787_v5, 0.0 }
 0x191   : > { %v1838_v54 = vand.u32 4294901760, %v4521_v33 }
 0x193   : > { %v1839_v3 = vsub.f32 %v4521_v33, %v1838_v54  ;;  %1944 = vmatmul.f32.vlgmr.msra.gmra.mxu1 %v1838_v54 }
 0x194   : > { %2347 = vmatpush.msra.mxu1 %v4198_v30 }
 0x195   : > { %1998 = vmatmul.f32.vlgmr.msra.gmra.mxu2 %v1839_v3  ;;  %v1840_v42 = vand.u32 4294901760, %v1839_v3 }
 0x196   : > { %2349 = vmatpush.msra.mxu1 %v4200_v45  ;;  %2388 = vmatpush.msra.mxu2 %v4211_v50  ;;  %v4787_v50 = vld [vmem:[#allocation22_spill] sm:$0xff] }
 0x197   : > { %2037 = vmatmul.f32.vlgmr.msra.gmra.mxu3 %v1840_v42  ;;  %v1841_v20 = vsub.f32 %v1839_v3, %v1840_v42  ;;  %v2766_v3 = vld [vmem:[%s4789_s29] ss:$0 sm:$0xff] }
 0x198   : > { %2351 = vmatpush.msra.mxu1 %v4229_v58  ;;  %2455 = vmatpush.msra.mxu3 %v4198_v30  ;;  %v4783_v30 = vld [vmem:[#allocation18_spill] sm:$0xff] }
 0x199   : > { %v1842_v38 = vand.u32 4294901760, %v1841_v20  ;;  %2392 = vmatpush.msra.mxu2 %v4214_v55  ;;  %v4788_v55 = vld [vmem:[#allocation23_spill] sm:$0xff] }
 0x19a   : > { %2353 = vmatpush.msra.mxu1 %v4235_v59  ;;  %2457 = vmatpush.msra.mxu3 %v4200_v45  ;;  %v4784_v45 = vld [vmem:[#allocation19_spill] sm:$0xff] }
 0x19b   : > { %1843 = vmatmul.f32.vlgmr.msra.gmra.mxu0 %v1842_v38  ;;  %2143 = vmatmul.f32.vlgmr.msrb.gmra.mxu1 %v1838_v54 }
 0x19c   : > { %2294 = vmatpush.msra.mxu0 %v4203_v19  ;;  %2355 = vmatpush.msra.mxu1 %v4245_v36  ;;  %v4785_v19 = vld [vmem:[#allocation20_spill] sm:$0xff] }
 0x19d   : > { %2459 = vmatpush.msra.mxu3 %v4229_v58  ;;  %2396 = vmatpush.msra.mxu2 %v4240_v60 }
 0x19e   : > { %2297 = vmatpush.msra.mxu0 %v4206_v21  ;;  %2357 = vmatpush.msra.mxu1 %v4260_v44  ;;  %v4786_v21 = vld [vmem:[#allocation21_spill] sm:$0xff] }
 0x19f   : > { %2461 = vmatpush.msra.mxu3 %v4235_v59  ;;  %2400 = vmatpush.msra.mxu2 %v4253_v15 }
 0x1a0   : > { %2300 = vmatpush.msra.mxu0 %v4233_v26  ;;  %2359 = vmatpush.msra.mxu1 %v4270_v49 }
 0x1a1   : > { %2463 = vmatpush.msra.mxu3 %v4245_v36  ;;  %2404 = vmatpush.msra.mxu2 %v4268_v46 }
 0x1a2   : > { %2303 = vmatpush.msra.mxu0 %v4243_v1  ;;  %2361 = vmatpush.msra.mxu1 %v4289_v22 }
 0x1a3   : > { %2106 = vmatmul.f32.vlgmr.msrb.gmra.mxu0 %v1838_v54  ;;  %2465 = vmatpush.msra.mxu3 %v4260_v44 }
 0x1a4   : > { %2306 = vmatpush.msra.mxu0 %v4256_v62  ;;  %2363 = vmatpush.msra.mxu1 %v4305_v14 }
 0x1a5   : > { %2467 = vmatpush.msra.mxu3 %v4270_v49  ;;  %2408 = vmatpush.msra.mxu2 %v4292_v27 }
 0x1a6   : > { %2309 = vmatpush.msra.mxu0 %v4277_v24  ;;  %2365 = vmatpush.msra.mxu1 %v4321_v35 }
 0x1a7   : > { %2469 = vmatpush.msra.mxu3 %v4289_v22  ;;  %2412 = vmatpush.msra.mxu2 %v4300_v48 }
 0x1a8   : > { %2312 = vmatpush.msra.mxu0 %v4287_v28  ;;  %2367 = vmatpush.msra.mxu1 %v4340_v11 }
 0x1a9   : > { %2471 = vmatpush.msra.mxu3 %v4305_v14  ;;  %2416 = vmatpush.msra.mxu2 %v4316_v56 }
 0x1aa   : > { %2315 = vmatpush.msra.mxu0 %v4303_v7  ;;  %2369 = vmatpush.msra.mxu1 %v4347_v6 }
 0x1ab   : > { %2473 = vmatpush.msra.mxu3 %v4321_v35  ;;  %2420 = vmatpush.msra.mxu2 %v4333_v57 }
 0x1ac   : > { %2318 = vmatpush.msra.mxu0 %v4783_v30  ;;  %2371 = vmatpush.msra.mxu1 %v4364_v23 }
 0x1ad   : > { %2475 = vmatpush.msra.mxu3 %v4340_v11  ;;  %2424 = vmatpush.msra.mxu2 %v4353_v63 }
 0x1ae   : > { %2321 = vmatpush.msra.mxu0 %v4784_v45  ;;  %2373 = vmatpush.msra.mxu1 %v4381_v16 }
 0x1af   : > { %2477 = vmatpush.msra.mxu3 %v4347_v6  ;;  %2428 = vmatpush.msra.mxu2 %v4372_v8 }
 0x1b0   : > { %2324 = vmatpush.msra.mxu0 %v4785_v19  ;;  %2375 = vmatpush.msra.mxu1 %v4390_v37 }
 0x1b1   : > { %2479 = vmatpush.msra.mxu3 %v4364_v23  ;;  %2432 = vmatpush.msra.mxu2 %v4376_v61 }
 0x1b2   : > { %2327 = vmatpush.msra.mxu0 %v4786_v21  ;;  %2377 = vmatpush.msra.mxu1 %v4392_v12 }
 0x1b3   : > { %2481 = vmatpush.msra.mxu3 %v4381_v16  ;;  %2436 = vmatpush.msra.mxu2 %v4398_v18 }
 0x1b4   : > { %2330 = vmatpush.msra.mxu0 %v4787_v50 }
 0x1b5   : > { %2483 = vmatpush.msra.mxu3 %v4390_v37  ;;  %2440 = vmatpush.msra.mxu2 %v4420_v4 }
 0x1b6   : > { %2333 = vmatpush.msra.mxu0 %v4788_v55 }
 0x1b7   : > { %2485 = vmatpush.msra.mxu3 %v4392_v12  ;;  %2444 = vmatpush.msra.mxu2 %v4426_v2 }
 0x1b8   : > { %2336 = vmatpush.msra.mxu0 %v4409_v32 }
 0x1b9   : > { %2448 = vmatpush.msra.mxu2 %v4429_v39 }
 0x1ba   : > { %2339 = vmatpush.msra.mxu0 %v4412_v9 }
 0x210   : > { %v1945_v58 = vpop.f32.mrf.mxu1 }
 0x218   : > { %v1844_v26 = vpop.f32.mrf.mxu0  ;;  %v1999_v60 = vpop.f32.mrf.mxu2 }
 0x219   : > { %v1946_v59 = vadd.f32 %v1945_v58, %v1844_v26  ;;  %v2144_v46 = vpop.f32.mrf.mxu1 }
 0x21a   : > { %v2038_v36 = vpop.f32.mrf.mxu3 }
 0x21b   : > { %v2000_v1 = vadd.f32 %v1999_v60, %v1946_v59 }
 0x21d   : > { %v2039_v15 = vadd.f32 %v2038_v36, %v2000_v1 }
 0x220   : > { %v2107_v62 = vpop.f32.mrf.mxu0 }
 0x221   : > { %v2108_v44 = vadd.f32 %v2107_v62, %v2039_v15 }
 0x223   : > { %v2145_v49 = vadd.f32 %v2144_v46, %v2108_v44 }
 0x225   : > { %v2147_v24 = vmul.f32 0.03125, %v2145_v49 }
 0x227   : > { %v4590_v28 = vsub.f32 %v4521_v33, %v2147_v24 }
 0x229   : > { %v2149_v22 = vmul.f32 %v4590_v28, %v4590_v28 }
 0x22b   : > { %v2182_v27 = vand.u32 4294901760, %v2149_v22 }
 0x22d   : > { %2288 = vmatmul.f32.vlgmr.msrb.gmra.mxu3 %v2182_v27  ;;  %v2183_v48 = vsub.f32 %v2149_v22, %v2182_v27 }
 0x22f   : > { %2342 = vmatmul.f32.vlgmr.msra.gmra.mxu0 %v2183_v48  ;;  %v2184_v7 = vand.u32 4294901760, %v2183_v48 }
 0x231   : > { %2381 = vmatmul.f32.vlgmr.msra.gmra.mxu1 %v2184_v7  ;;  %v2185_v14 = vsub.f32 %v2183_v48, %v2184_v7 }
 0x233   : > { %v2186_v56 = vand.u32 4294901760, %v2185_v14 }
 0x235   : > { %2187 = vmatmul.f32.vlgmr.msrb.gmra.mxu2 %v2186_v56  ;;  %2487 = vmatmul.f32.vlgmr.msra.gmra.mxu3 %v2182_v27 }
 0x23d   : > { %2450 = vmatmul.f32.vlgmr.msra.gmra.mxu2 %v2182_v27 }
 0x2ac   : > { %v2343_v6 = vpop.f32.mrf.mxu0 }
 0x2ae   : > { %v2382_v4 = vpop.f32.mrf.mxu1 }
 0x2b0   : > { %v2289_v35 = vpop.f32.mrf.mxu3 }
 0x2b8   : > { %v2188_v57 = vpop.f32.mrf.mxu2  ;;  %v2488_v16 = vpop.f32.mrf.mxu3 }
 0x2b9   : > { %v2290_v11 = vadd.f32 %v2289_v35, %v2188_v57 }
 0x2bb   : > { %v2344_v63 = vadd.f32 %v2343_v6, %v2290_v11 }
 0x2bd   : > { %v2383_v23 = vadd.f32 %v2382_v4, %v2344_v63 }
 0x2c0   : > { %v2451_v8 = vpop.f32.mrf.mxu2 }
 0x2c1   : > { %v2452_v61 = vadd.f32 %v2451_v8, %v2383_v23 }
 0x2c3   : > { %v2489_v37 = vadd.f32 %v2488_v16, %v2452_v61 }
 0x2c5   : > { %v2491_v12 = vmul.f32 0.03125, %v2489_v37 }
 0x2c7   : > { %v2493_v18 = vadd.f32 1e-05, %v2491_v12 }
 0x2c9   : > { %2767 = vrsqrt.f32 %v2493_v18  ;;  %vm2501_vm0 = vcmp.eq.f32.partialorder %v2493_v18, inf  ;;  %v2504_v31 = vand.u32 2147483648, %v2493_v18  ;;  %vm2503_vm1 = vcmp.eq.f32.partialorder %v2493_v18, 0.0 }
 0x2cf   : > { %v2768_v32 = vpop.eup %2767 }
 0x2d0   : > { %v2495_v9 = vmul.f32 %v2768_v32, %v2493_v18 }
 0x2d2   : > { %v2496_v2 = vmul.f32 %v2768_v32, %v2495_v9 }
 0x2d4   : > { %v2497_v39 = vmul.f32 0.5, %v2496_v2 }
 0x2d6   : > { %v2498_v52 = vsub.f32 1.5, %v2497_v39 }
 0x2d8   : > { %v2499_v34 = vmul.f32 %v2768_v32, %v2498_v52 }
 0x2da   : > { %v2500_v47 = vmul.f32 %v2499_v34, %v2493_v18 }
 0x2dc   : > { %v2502_v43 = vsel %vm2501_vm0, %v2493_v18, %v2500_v47 }
 0x2dd   : > { %v2505_v13 = vsel %vm2503_vm1, %v2504_v31, %v2502_v43 }
 0x2de   : > { %2769 = vrcp.f32 %v2505_v13  ;;  %v2520_v29 = vand.u32 2147483648, %v2505_v13  ;;  %v2518_v53 = vand.u32 2147483647, %v2505_v13  ;;  %vm2514_vm3 = vweird.f32 %v2505_v13 }
 0x2e0   : > { %v2521_v17 = vor.u32 1.1754944e-38, %v2520_v29  ;;  %vm2519_vm5 = vcmp.eq.f32.partialorder %v2518_v53, 8.507059e+37 }
 0x2e4   : > { %v2770_v10 = vpop.eup %2769 }
 0x2e5   : > { %v2510_v41 = vmul.f32 %v2770_v10, %v2505_v13  ;;  %vm2515_vm2 = vweird.f32 %v2770_v10 }
 0x2e6   : > { %vm2516_vm4 = vmor %vm2514_vm3, %vm2515_vm2 }
 0x2e7   : > { %v2511_v25 = vsub.f32 1.0, %v2510_v41 }
 0x2e9   : > { %v2512_v40 = vmul.f32 %v2770_v10, %v2511_v25 }
 0x2eb   : > { %v2513_v0 = vadd.f32 %v2770_v10, %v2512_v40 }
 0x2ed   : > { %v2517_v5 = vsel %vm2516_vm4, %v2770_v10, %v2513_v0 }
 0x2ee   : > { %v2522_v33 = vsel %vm2519_vm5, %v2521_v17, %v2517_v5 }
 0x2ef   : > { %v2523_v54 = vmul.f32 %v2765_v51, %v2522_v33 }
 0x2f1   : > { %v2524_v42 = vmul.f32 %v2523_v54, %v4590_v28 }
 0x2f3   : > { %v2529_v20 = vadd.f32 %v2766_v3, %v2524_v42 }
 0x2f5   : > { %2530 = vst [vmem:[%s345_s9] sm:$0x3] %v2529_v20 }
 0x2f6   : > { %2888 = shalt.err (!%p2885_p13)
}
 0x2f7   : > { %2692 = dma.vmem_to_hbm [thread:$0]  (%p3065_p4), %s2546_s12, 32, %s2548_s11, %s2532_s13  }
 0x2f8 PF: > { %s4790_s10 = sld [smem:[#allocation13_spill]]  ;;  %p2706_p0 = pnand %p2666_p6, %p3073_p7 }
 0x2fa   : > { %p2707_p2 = pneg %p2706_p0 }
 0x2fe   : > { %s2559_s19 = sand.u32 1, %s4790_s10  }
 0x2ff   : > { %s2560_s20 = scalar_lea.sflag [#allocation4], %s2559_s19 }
 0x300   : > { %2926 = dma.done.wait (%p2707_p2), %s2560_s20, 32  }
 0x301   : > { %2928 = vsyncadd (%p2707_p2), %s2560_s20, 4294967264  ;;  %s25_s26 = sadd.s32 1, %s2951_s26   ;;  %s4792_s28 = sld [smem:[#allocation14_spill]] }
 0x302   : > { %p22_p5 = scmp.ge.s32.totalorder %s25_s26, 4   ;;  %s4793_s23 = sld [smem:[#allocation16_spill]] }
 0x303   : > { %s4794_s18 = sld [smem:[#allocation15_spill]]  ;;  %s4795_s21 = smov %s2935_s22 }
 0x304   : > { %s4797_s24 = smov %s2947_s25 }
 0x305   :  { %24 = sbr.rel (!%p22_p5) target bundleno = 11 (0xb), region = 106 }
 0x307   : > { %s4796_s22 = smov %s4792_s28 }
 0x309   : > { %s4798_s25 = smov %s4794_s18 }
 0x30a   :  { %2566 = vsyncpa [#allocation3], 1 }
 0x30b   :  { %2568 = vsyncpa [#allocation3 + $0x1], 1 }
 0x30c   :  { %2569 = vsyncpa [#allocation6], 1 }
 0x30d   :  { %2571 = vsyncpa [#allocation6 + $0x1], 1 }
 0x30e   :  { %2572 = vsyncpa [#allocation4], 1 }
 0x30f   :  { %2574 = vsyncpa [#allocation4 + $0x1], 1 }

</bundles_post_ra>
